<compile_context>
chip_gen: v7x
topology: tpu7x:2x2x1
jax: 0.10.0
libtpu: 0.0.40
codegen_flags: <defaults>
</compile_context>

<pallas_src>
import functools

import jax
import jax.numpy as jnp
from jax import lax
from jax.experimental import pallas as pl
from jax.experimental.pallas import tpu as pltpu


def _round_up(x, m):
    return (x + m - 1) // m * m


# ----------------------------------------------------------------------------
# Fused Pallas kernel: all LSTM layers (wavefront) + FC in one launch
# ----------------------------------------------------------------------------
def _fused_lstm_fc_kernel(n_layers, T, BC, H, *refs):
    """refs = (x_ref,                     # (T*BC, D0) bf16, time-major batch chunk
               wih_0, whh_0, b_0, ...,    # per layer: (D_l,4H) bf16, (H,4H) bf16, (1,4H) f32
               wfc_ref, bfc_ref,          # (T*H, Opad) bf16, (1, Opad) f32
               out_ref,                   # (BC, Opad) f32
               xg_sc, act_sc)             # scratch: (T*BC, 4H) f32, (T*BC, H) f32
    """
    x_ref = refs[0]
    layer_refs = refs[1:1 + 3 * n_layers]
    wfc_ref, bfc_ref, out_ref, xg_sc, act_sc = refs[1 + 3 * n_layers:]

    f32 = jnp.float32
    bf16 = jnp.bfloat16

    # Hoisted layer-0 input projection + fused bias: one big matmul over the
    # whole sequence, off the serial recurrence chain.
    xg_sc[...] = (
        jnp.dot(x_ref[...], layer_refs[0][...], preferred_element_type=f32)
        + layer_refs[2][...]
    )

    # Per-layer weights / biases, loaded once.
    wih = [layer_refs[3 * l + 0][...] for l in range(n_layers)]
    whh = [layer_refs[3 * l + 1][...] for l in range(n_layers)]
    bias = [None] + [
        jnp.broadcast_to(layer_refs[3 * l + 2][...], (BC, 4 * H))
        for l in range(1, n_layers)
    ]

    S = T + n_layers - 1  # wavefront steps: layer l handles timestep t = s - l

    def step(s, carry):
        new = list(carry)
        for l in range(n_layers):
            h = carry[2 * l]
            c = carry[2 * l + 1]
            t = s - l
            active = jnp.logical_and(t >= 0, t < T)
            t_c = jnp.clip(t, 0, T - 1)
            if l == 0:
                row = pl.multiple_of(t_c * BC, BC)
                gin = xg_sc[pl.ds(row, BC), :]
            else:
                # Layer l-1's output at time t is its carry from the previous
                # step (SSA: carries are read before any update this step).
                h_below = carry[2 * (l - 1)]
                gin = jnp.dot(h_below.astype(bf16), wih[l],
                              preferred_element_type=f32) + bias[l]
            gates = gin + jnp.dot(h.astype(bf16), whh[l],
                                  preferred_element_type=f32)  # (BC,4H) i,f,g,o
            # Whole-vreg EUP calls, slice gates afterwards.
            sig = jax.nn.sigmoid(gates)
            tah = jnp.tanh(gates)
            i_g = sig[:, 0 * H:1 * H]
            f_g = sig[:, 1 * H:2 * H]
            g_g = tah[:, 2 * H:3 * H]
            o_g = sig[:, 3 * H:4 * H]
            c_new = f_g * c + i_g * g_g
            h_new = o_g * jnp.tanh(c_new)
            new[2 * l] = jnp.where(active, h_new, h)
            new[2 * l + 1] = jnp.where(active, c_new, c)
            if l == n_layers - 1:
                @pl.when(active)
                def _(h_new=h_new, t_c=t_c):
                    row_o = pl.multiple_of(t_c * BC, BC)
                    act_sc[pl.ds(row_o, BC), :] = h_new
        return tuple(new)

    init = tuple(jnp.zeros((BC, H), f32) for _ in range(2 * n_layers))
    unroll = True if S <= 16 else 4
    lax.fori_loop(0, S, step, init, unroll=unroll)

    # FC epilogue: repack (T*BC, H) -> (BC, T*H) once (static lane concat),
    # then ONE big-K matmul instead of T small accumulating dots.
    fc_in = jnp.concatenate(
        [act_sc[t * BC:(t + 1) * BC, :] for t in range(T)], axis=1)
    out_ref[...] = (
        jnp.dot(fc_in.astype(bf16), wfc_ref[...], preferred_element_type=f32)
        + bfc_ref[...]
    )


# ----------------------------------------------------------------------------
# Wrapper
# ----------------------------------------------------------------------------
def lstm_model_pallas(x, params_flat):
    """x: (B, T, input_size) batch-first, like the PyTorch module."""
    lstm_params, (w_fc, b_fc) = params_flat
    B, T, D0 = x.shape
    n_layers = len(lstm_params)
    H = lstm_params[0][1].shape[1]
    O = w_fc.shape[0]

    Bp = _round_up(B, 8)
    BC = Bp if Bp <= 32 else 32        # per-grid-step batch chunk (M dim)
    Bp = _round_up(Bp, BC)
    nb = Bp // BC                      # grid size; shards across TCs on v7x
    Opad = _round_up(O, 128)           # lane-dense FC output

    # Time-major, batch-chunked slab: rows ordered (chunk, t, b_local).
    # TODO(synk): at large shapes, fold this transpose/pad into a 3-D BlockSpec
    # over the native (B, T, D) layout so x is only read once from HBM.
    x_tm = jnp.transpose(x.astype(jnp.float32), (1, 0, 2))     # (T, B, D0)
    x_tm = jnp.pad(x_tm, ((0, 0), (0, Bp - B), (0, 0)))         # (T, Bp, D0)
    x_tm = x_tm.reshape(T, nb, BC, D0).transpose(1, 0, 2, 3)    # (nb, T, BC, D0)
    x2d = x_tm.reshape(nb * T * BC, D0).astype(jnp.bfloat16)

    inputs = [x2d]
    in_specs = [pl.BlockSpec((T * BC, D0), lambda i: (i, 0))]
    for (w_ih, w_hh, b_ih, b_hh) in lstm_params:
        d_l = w_ih.shape[1]
        inputs += [
            w_ih.T.astype(jnp.bfloat16),                              # (d_l, 4H)
            w_hh.T.astype(jnp.bfloat16),                              # (H, 4H)
            (b_ih + b_hh).reshape(1, 4 * H).astype(jnp.float32),      # (1, 4H)
        ]
        in_specs += [
            pl.BlockSpec((d_l, 4 * H), lambda i: (0, 0)),
            pl.BlockSpec((H, 4 * H), lambda i: (0, 0)),
            pl.BlockSpec((1, 4 * H), lambda i: (0, 0)),
        ]

    # Flattened FC weight: wfc_flat[t*H + h, o] = w_fc[o, t*H + h]; lane-padded.
    wfc_flat = jnp.pad(w_fc.T.astype(jnp.bfloat16), ((0, 0), (0, Opad - O)))
    bfc_p = jnp.pad(b_fc.reshape(1, O).astype(jnp.float32),
                    ((0, 0), (0, Opad - O)))
    inputs += [wfc_flat, bfc_p]
    in_specs += [
        pl.BlockSpec((T * H, Opad), lambda i: (0, 0)),
        pl.BlockSpec((1, Opad), lambda i: (0, 0)),
    ]

    # VMEM budget: actual residency + headroom, capped per generation.
    io_bytes = sum(int(a.size) * a.dtype.itemsize for a in inputs) + Bp * Opad * 4
    scratch_bytes = 4 * (T * BC * 4 * H + T * BC * H)
    try:
        phys_vmem = int(pltpu.get_tpu_info().vmem_capacity_bytes)
    except Exception:
        phys_vmem = 64 * 1024 * 1024
    vmem_limit = int(max(16 << 20,
                         min(2 * io_bytes + scratch_bytes + (8 << 20),
                             int(phys_vmem * 0.85))))

    flops = 2 * T * Bp * D0 * 4 * H                              # layer-0 input proj
    flops += 2 * T * Bp * H * 4 * H * max(n_layers - 1, 0)       # layer>=1 input proj
    flops += 2 * T * Bp * H * 4 * H * n_layers                   # recurrent proj
    flops += 2 * Bp * (T * H) * Opad                             # FC
    transcendentals = 9 * T * Bp * H * n_layers

    out = pl.pallas_call(
        functools.partial(_fused_lstm_fc_kernel, n_layers, T, BC, H),
        out_shape=jax.ShapeDtypeStruct((Bp, Opad), jnp.float32),
        grid=(nb,),
        in_specs=in_specs,
        out_specs=pl.BlockSpec((BC, Opad), lambda i: (i, 0)),
        scratch_shapes=[
            pltpu.VMEM((T * BC, 4 * H), jnp.float32),   # layer-0 hoisted gates
            pltpu.VMEM((T * BC, H), jnp.float32),       # last-layer outputs
        ],
        compiler_params=pltpu.CompilerParams(
            dimension_semantics=("parallel",),
            vmem_limit_bytes=vmem_limit,
        ),
        cost_estimate=pl.CostEstimate(
            flops=int(flops),
            transcendentals=int(transcendentals),
            bytes_accessed=int(io_bytes),
        ),
    )(*inputs)

    return out[:B, :O]


lstm_model_forward = jax.jit(lstm_model_pallas)


# ----------------------------------------------------------------------------
# Init + pure-JAX reference
# ----------------------------------------------------------------------------
def init_params(key, input_size, hidden_size, n_layers, output_size, seq_length):
    """Deterministic init mirroring nn.LSTM / nn.Linear default shapes."""
    params = {"lstm": [], "fc": None}
    k_lstm = 1.0 / jnp.sqrt(hidden_size)
    for layer in range(n_layers):
        in_dim = input_size if layer == 0 else hidden_size
        key, k1, k2, k3, k4 = jax.random.split(key, 5)
        w_ih = jax.random.uniform(k1, (4 * hidden_size, in_dim), jnp.float32, -k_lstm, k_lstm)
        w_hh = jax.random.uniform(k2, (4 * hidden_size, hidden_size), jnp.float32, -k_lstm, k_lstm)
        b_ih = jax.random.uniform(k3, (4 * hidden_size,), jnp.float32, -k_lstm, k_lstm)
        b_hh = jax.random.uniform(k4, (4 * hidden_size,), jnp.float32, -k_lstm, k_lstm)
        params["lstm"].append((w_ih, w_hh, b_ih, b_hh))
    in_f = hidden_size * seq_length
    k_fc = 1.0 / jnp.sqrt(in_f)
    key, k1, k2 = jax.random.split(key, 3)
    w_fc = jax.random.uniform(k1, (output_size, in_f), jnp.float32, -k_fc, k_fc)
    b_fc = jax.random.uniform(k2, (output_size,), jnp.float32, -k_fc, k_fc)
    params["fc"] = (w_fc, b_fc)
    return params


def lstm_model_reference(x, params_flat):
    """Pure-JAX f32 reference (matches PyTorch LSTM + Linear semantics)."""
    lstm_params, (w_fc, b_fc) = params_flat
    B, T, _ = x.shape
    xs = x.astype(jnp.float32)
    for (w_ih, w_hh, b_ih, b_hh) in lstm_params:
        H = w_hh.shape[1]
        h = jnp.zeros((B, H), jnp.float32)
        c = jnp.zeros((B, H), jnp.float32)
        outs = []
        for t in range(T):
            gates = xs[:, t, :] @ w_ih.T + b_ih + h @ w_hh.T + b_hh
            i = jax.nn.sigmoid(gates[:, 0 * H:1 * H])
            f = jax.nn.sigmoid(gates[:, 1 * H:2 * H])
            g = jnp.tanh(gates[:, 2 * H:3 * H])
            o = jax.nn.sigmoid(gates[:, 3 * H:4 * H])
            c = f * c + i * g
            h = o * jnp.tanh(c)
            outs.append(h)
        xs = jnp.stack(outs, axis=1)  # (B, T, H)
    flat = xs.reshape(B, -1)
    return flat @ w_fc.T + b_fc


if __name__ == "__main__":
    # Small shapes consistent with the module's forward.
    batch = 2
    seq_length = 8
    input_size = 16
    hidden_size = 32
    n_layers = 2
    output_size = 10

    key = jax.random.PRNGKey(0)
    key, kx = jax.random.split(key)
    x = jax.random.normal(kx, (batch, seq_length, input_size), jnp.float32)

    params = init_params(key, input_size, hidden_size, n_layers, output_size, seq_length)
    params_flat = (tuple(params["lstm"]), params["fc"])

    out = lstm_model_forward(x, params_flat)
    out = jax.block_until_ready(out)

    ref = lstm_model_reference(x, params_flat)
    assert out.shape == (batch, output_size), out.shape
    # bf16 matmul operands with f32 accumulation -> loosened tolerance vs f32 ref.
    assert jnp.allclose(out, ref, atol=3e-2, rtol=3e-2), (
        f"max abs err {jnp.max(jnp.abs(out - ref))}"
    )
    print("KERNEL_OK")
</pallas_src>

<mosaic_0001>
module attributes {stable_mosaic.version = 11 : i64} {
  func.func @_fused_lstm_fc_kernel(%arg0: i32, %arg1: memref<64x16xbf16, #tpu.memory_space<vmem>>, %arg2: memref<16x128xbf16, #tpu.memory_space<vmem>>, %arg3: memref<32x128xbf16, #tpu.memory_space<vmem>>, %arg4: memref<1x128xf32, #tpu.memory_space<vmem>>, %arg5: memref<32x128xbf16, #tpu.memory_space<vmem>>, %arg6: memref<32x128xbf16, #tpu.memory_space<vmem>>, %arg7: memref<1x128xf32, #tpu.memory_space<vmem>>, %arg8: memref<256x128xbf16, #tpu.memory_space<vmem>>, %arg9: memref<1x128xf32, #tpu.memory_space<vmem>>, %arg10: memref<8x128xf32, #tpu.memory_space<vmem>>, %arg11: memref<64x128xf32, #tpu.memory_space<vmem>>, %arg12: memref<64x32xf32, #tpu.memory_space<vmem>>) attributes {dimension_semantics = [#tpu.dimension_semantics<parallel>], iteration_bounds = array<i64: 1>, scalar_prefetch = 0 : i64, scratch_operands = 2 : i64, tpu.core_type = #tpu.core_type<tc>, window_params = [{transform_indices = @transform_0, window_bounds = array<i64: 64, 16>}, {pipeline_mode = #tpu.pipeline_mode<synchronous>, transform_indices = @transform_1, window_bounds = array<i64: 16, 128>}, {pipeline_mode = #tpu.pipeline_mode<synchronous>, transform_indices = @transform_2, window_bounds = array<i64: 32, 128>}, {pipeline_mode = #tpu.pipeline_mode<synchronous>, transform_indices = @transform_3, window_bounds = array<i64: 1, 128>}, {pipeline_mode = #tpu.pipeline_mode<synchronous>, transform_indices = @transform_4, window_bounds = array<i64: 32, 128>}, {pipeline_mode = #tpu.pipeline_mode<synchronous>, transform_indices = @transform_5, window_bounds = array<i64: 32, 128>}, {pipeline_mode = #tpu.pipeline_mode<synchronous>, transform_indices = @transform_6, window_bounds = array<i64: 1, 128>}, {pipeline_mode = #tpu.pipeline_mode<synchronous>, transform_indices = @transform_7, window_bounds = array<i64: 256, 128>}, {pipeline_mode = #tpu.pipeline_mode<synchronous>, transform_indices = @transform_8, window_bounds = array<i64: 1, 128>}, {transform_indices = @transform_9, window_bounds = array<i64: 8, 128>}]} {
    %c0 = arith.constant 0 : index
    %c0_0 = arith.constant 0 : index
    %0 = vector.load %arg1[%c0, %c0_0] : memref<64x16xbf16, #tpu.memory_space<vmem>>, vector<64x16xbf16>
    %c0_1 = arith.constant 0 : index
    %c0_2 = arith.constant 0 : index
    %1 = vector.load %arg2[%c0_1, %c0_2] : memref<16x128xbf16, #tpu.memory_space<vmem>>, vector<16x128xbf16>
    %cst = arith.constant dense<0.000000e+00> : vector<64x128xf32>
    %2 = tpu.matmul %0, %1, %cst {dimension_numbers = #tpu.dot_dimension_numbers<[1], [0], [0], [1], [0, 0, 1, 1], [], []>} : vector<64x16xbf16>, vector<16x128xbf16>, vector<64x128xf32> -> vector<64x128xf32>
    %c0_3 = arith.constant 0 : index
    %c0_4 = arith.constant 0 : index
    %3 = vector.load %arg4[%c0_3, %c0_4] : memref<1x128xf32, #tpu.memory_space<vmem>>, vector<1x128xf32>
    %4 = vector.broadcast %3 : vector<1x128xf32> to vector<64x128xf32>
    %5 = arith.addf %2, %4 : vector<64x128xf32>
    %c0_5 = arith.constant 0 : index
    %c0_6 = arith.constant 0 : index
    %6 = vector.load %arg11[%c0_5, %c0_6] : memref<64x128xf32, #tpu.memory_space<vmem>>, vector<64x128xf32>
    tpu.vector_store %arg11[%c0_5, %c0_6], %5 {strides = array<i32>} : memref<64x128xf32, #tpu.memory_space<vmem>>, vector<64x128xf32>,
    %c0_7 = arith.constant 0 : index
    %c0_8 = arith.constant 0 : index
    %7 = vector.load %arg5[%c0_7, %c0_8] : memref<32x128xbf16, #tpu.memory_space<vmem>>, vector<32x128xbf16>
    %c0_9 = arith.constant 0 : index
    %c0_10 = arith.constant 0 : index
    %8 = vector.load %arg3[%c0_9, %c0_10] : memref<32x128xbf16, #tpu.memory_space<vmem>>, vector<32x128xbf16>
    %c0_11 = arith.constant 0 : index
    %c0_12 = arith.constant 0 : index
    %9 = vector.load %arg6[%c0_11, %c0_12] : memref<32x128xbf16, #tpu.memory_space<vmem>>, vector<32x128xbf16>
    %c0_13 = arith.constant 0 : index
    %c0_14 = arith.constant 0 : index
    %10 = vector.load %arg7[%c0_13, %c0_14] : memref<1x128xf32, #tpu.memory_space<vmem>>, vector<1x128xf32>
    %11 = vector.shape_cast %10 : vector<1x128xf32> to vector<1x128xf32>
    %12 = vector.broadcast %11 : vector<1x128xf32> to vector<8x128xf32>
    %cst_15 = arith.constant 0.000000e+00 : f32
    %13 = vector.broadcast %cst_15 : f32 to vector<8x32xf32>
    %cst_16 = arith.constant 0.000000e+00 : f32
    %14 = vector.broadcast %cst_16 : f32 to vector<8x32xf32>
    %cst_17 = arith.constant 0.000000e+00 : f32
    %15 = vector.broadcast %cst_17 : f32 to vector<8x32xf32>
    %cst_18 = arith.constant 0.000000e+00 : f32
    %16 = vector.broadcast %cst_18 : f32 to vector<8x32xf32>
    %c0_i32 = arith.constant 0 : i32
    %c0_i32_19 = arith.constant 0 : i32
    %17 = arith.subi %c0_i32, %c0_i32_19 : i32
    %c0_i32_20 = arith.constant 0 : i32
    %18 = arith.cmpi sge, %17, %c0_i32_20 : i32
    %c8_i32 = arith.constant 8 : i32
    %19 = arith.cmpi slt, %17, %c8_i32 : i32
    %20 = arith.andi %18, %19 : i1
    %c0_i32_21 = arith.constant 0 : i32
    %c7_i32 = arith.constant 7 : i32
    %21 = arith.maxsi %c0_i32_21, %17 : i32
    %22 = arith.minsi %c7_i32, %21 : i32
    %c8_i32_22 = arith.constant 8 : i32
    %23 = arith.muli %22, %c8_i32_22 : i32
    %24 = tpu.assume_multiple %23, 8 : i32
    %25 = arith.index_cast %24 : i32 to index
    %c0_23 = arith.constant 0 : index
    %26 = vector.load %arg11[%25, %c0_23] : memref<64x128xf32, #tpu.memory_space<vmem>>, vector<8x128xf32>
    %27 = arith.truncf %13 : vector<8x32xf32> to vector<8x32xbf16>
    %cst_24 = arith.constant dense<0.000000e+00> : vector<8x128xf32>
    %28 = tpu.matmul %27, %8, %cst_24 {dimension_numbers = #tpu.dot_dimension_numbers<[1], [0], [0], [1], [0, 0, 1, 1], [], []>} : vector<8x32xbf16>, vector<32x128xbf16>, vector<8x128xf32> -> vector<8x128xf32>
    %29 = arith.addf %26, %28 : vector<8x128xf32>
    %30 = arith.negf %29 : vector<8x128xf32>
    %31 = math.exp %30 : vector<8x128xf32>
    %cst_25 = arith.constant 1.000000e+00 : f32
    %32 = vector.broadcast %cst_25 : f32 to vector<8x128xf32>
    %33 = arith.addf %32, %31 : vector<8x128xf32>
    %34 = arith.divf %32, %33 : vector<8x128xf32>
    %35 = math.tanh %29 : vector<8x128xf32>
    %36 = vector.extract_strided_slice %34 {offsets = [0, 0], sizes = [8, 32], strides = [1, 1]} : vector<8x128xf32> to vector<8x32xf32>
    %37 = vector.extract_strided_slice %34 {offsets = [0, 32], sizes = [8, 32], strides = [1, 1]} : vector<8x128xf32> to vector<8x32xf32>
    %38 = vector.extract_strided_slice %35 {offsets = [0, 64], sizes = [8, 32], strides = [1, 1]} : vector<8x128xf32> to vector<8x32xf32>
    %39 = vector.extract_strided_slice %34 {offsets = [0, 96], sizes = [8, 32], strides = [1, 1]} : vector<8x128xf32> to vector<8x32xf32>
    %40 = arith.mulf %37, %14 : vector<8x32xf32>
    %41 = arith.mulf %36, %38 : vector<8x32xf32>
    %42 = arith.addf %40, %41 : vector<8x32xf32>
    %43 = math.tanh %42 : vector<8x32xf32>
    %44 = arith.mulf %39, %43 : vector<8x32xf32>
    %45 = arith.select %20, %44, %13 : vector<8x32xf32>
    %46 = arith.select %20, %42, %14 : vector<8x32xf32>
    %c1_i32 = arith.constant 1 : i32
    %47 = arith.subi %c0_i32, %c1_i32 : i32
    %c0_i32_26 = arith.constant 0 : i32
    %48 = arith.cmpi sge, %47, %c0_i32_26 : i32
    %c8_i32_27 = arith.constant 8 : i32
    %49 = arith.cmpi slt, %47, %c8_i32_27 : i32
    %50 = arith.andi %48, %49 : i1
    %c0_i32_28 = arith.constant 0 : i32
    %c7_i32_29 = arith.constant 7 : i32
    %51 = arith.maxsi %c0_i32_28, %47 : i32
    %52 = arith.minsi %c7_i32_29, %51 : i32
    %53 = arith.truncf %13 : vector<8x32xf32> to vector<8x32xbf16>
    %cst_30 = arith.constant dense<0.000000e+00> : vector<8x128xf32>
    %54 = tpu.matmul %53, %7, %cst_30 {dimension_numbers = #tpu.dot_dimension_numbers<[1], [0], [0], [1], [0, 0, 1, 1], [], []>} : vector<8x32xbf16>, vector<32x128xbf16>, vector<8x128xf32> -> vector<8x128xf32>
    %55 = arith.addf %54, %12 : vector<8x128xf32>
    %56 = arith.truncf %15 : vector<8x32xf32> to vector<8x32xbf16>
    %cst_31 = arith.constant dense<0.000000e+00> : vector<8x128xf32>
    %57 = tpu.matmul %56, %9, %cst_31 {dimension_numbers = #tpu.dot_dimension_numbers<[1], [0], [0], [1], [0, 0, 1, 1], [], []>} : vector<8x32xbf16>, vector<32x128xbf16>, vector<8x128xf32> -> vector<8x128xf32>
    %58 = arith.addf %55, %57 : vector<8x128xf32>
    %59 = arith.negf %58 : vector<8x128xf32>
    %60 = math.exp %59 : vector<8x128xf32>
    %cst_32 = arith.constant 1.000000e+00 : f32
    %61 = vector.broadcast %cst_32 : f32 to vector<8x128xf32>
    %62 = arith.addf %61, %60 : vector<8x128xf32>
    %63 = arith.divf %61, %62 : vector<8x128xf32>
    %64 = math.tanh %58 : vector<8x128xf32>
    %65 = vector.extract_strided_slice %63 {offsets = [0, 0], sizes = [8, 32], strides = [1, 1]} : vector<8x128xf32> to vector<8x32xf32>
    %66 = vector.extract_strided_slice %63 {offsets = [0, 32], sizes = [8, 32], strides = [1, 1]} : vector<8x128xf32> to vector<8x32xf32>
    %67 = vector.extract_strided_slice %64 {offsets = [0, 64], sizes = [8, 32], strides = [1, 1]} : vector<8x128xf32> to vector<8x32xf32>
    %68 = vector.extract_strided_slice %63 {offsets = [0, 96], sizes = [8, 32], strides = [1, 1]} : vector<8x128xf32> to vector<8x32xf32>
    %69 = arith.mulf %66, %16 : vector<8x32xf32>
    %70 = arith.mulf %65, %67 : vector<8x32xf32>
    %71 = arith.addf %69, %70 : vector<8x32xf32>
    %72 = math.tanh %71 : vector<8x32xf32>
    %73 = arith.mulf %68, %72 : vector<8x32xf32>
    %74 = arith.select %50, %73, %15 : vector<8x32xf32>
    %75 = arith.select %50, %71, %16 : vector<8x32xf32>
    %76 = arith.extui %50 : i1 to i32
    %c0_i32_33 = arith.constant 0 : i32
    %77 = arith.cmpi ne, %76, %c0_i32_33 : i32
    scf.if %77 {
      %c8_i32_197 = arith.constant 8 : i32
      %582 = arith.muli %52, %c8_i32_197 : i32
      %583 = tpu.assume_multiple %582, 8 : i32
      %584 = arith.index_cast %583 : i32 to index
      %c0_198 = arith.constant 0 : index
      %585 = vector.load %arg12[%584, %c0_198] : memref<64x32xf32, #tpu.memory_space<vmem>>, vector<8x32xf32>
      tpu.vector_store %arg12[%584, %c0_198], %73 {strides = array<i32>} : memref<64x32xf32, #tpu.memory_space<vmem>>, vector<8x32xf32>,
    } else {
    }
    %c1_i32_34 = arith.constant 1 : i32
    %c0_i32_35 = arith.constant 0 : i32
    %78 = arith.subi %c1_i32_34, %c0_i32_35 : i32
    %c0_i32_36 = arith.constant 0 : i32
    %79 = arith.cmpi sge, %78, %c0_i32_36 : i32
    %c8_i32_37 = arith.constant 8 : i32
    %80 = arith.cmpi slt, %78, %c8_i32_37 : i32
    %81 = arith.andi %79, %80 : i1
    %c0_i32_38 = arith.constant 0 : i32
    %c7_i32_39 = arith.constant 7 : i32
    %82 = arith.maxsi %c0_i32_38, %78 : i32
    %83 = arith.minsi %c7_i32_39, %82 : i32
    %c8_i32_40 = arith.constant 8 : i32
    %84 = arith.muli %83, %c8_i32_40 : i32
    %85 = tpu.assume_multiple %84, 8 : i32
    %86 = arith.index_cast %85 : i32 to index
    %c0_41 = arith.constant 0 : index
    %87 = vector.load %arg11[%86, %c0_41] : memref<64x128xf32, #tpu.memory_space<vmem>>, vector<8x128xf32>
    %88 = arith.truncf %45 : vector<8x32xf32> to vector<8x32xbf16>
    %cst_42 = arith.constant dense<0.000000e+00> : vector<8x128xf32>
    %89 = tpu.matmul %88, %8, %cst_42 {dimension_numbers = #tpu.dot_dimension_numbers<[1], [0], [0], [1], [0, 0, 1, 1], [], []>} : vector<8x32xbf16>, vector<32x128xbf16>, vector<8x128xf32> -> vector<8x128xf32>
    %90 = arith.addf %87, %89 : vector<8x128xf32>
    %91 = arith.negf %90 : vector<8x128xf32>
    %92 = math.exp %91 : vector<8x128xf32>
    %cst_43 = arith.constant 1.000000e+00 : f32
    %93 = vector.broadcast %cst_43 : f32 to vector<8x128xf32>
    %94 = arith.addf %93, %92 : vector<8x128xf32>
    %95 = arith.divf %93, %94 : vector<8x128xf32>
    %96 = math.tanh %90 : vector<8x128xf32>
    %97 = vector.extract_strided_slice %95 {offsets = [0, 0], sizes = [8, 32], strides = [1, 1]} : vector<8x128xf32> to vector<8x32xf32>
    %98 = vector.extract_strided_slice %95 {offsets = [0, 32], sizes = [8, 32], strides = [1, 1]} : vector<8x128xf32> to vector<8x32xf32>
    %99 = vector.extract_strided_slice %96 {offsets = [0, 64], sizes = [8, 32], strides = [1, 1]} : vector<8x128xf32> to vector<8x32xf32>
    %100 = vector.extract_strided_slice %95 {offsets = [0, 96], sizes = [8, 32], strides = [1, 1]} : vector<8x128xf32> to vector<8x32xf32>
    %101 = arith.mulf %98, %46 : vector<8x32xf32>
    %102 = arith.mulf %97, %99 : vector<8x32xf32>
    %103 = arith.addf %101, %102 : vector<8x32xf32>
    %104 = math.tanh %103 : vector<8x32xf32>
    %105 = arith.mulf %100, %104 : vector<8x32xf32>
    %106 = arith.select %81, %105, %45 : vector<8x32xf32>
    %107 = arith.select %81, %103, %46 : vector<8x32xf32>
    %c1_i32_44 = arith.constant 1 : i32
    %108 = arith.subi %c1_i32_34, %c1_i32_44 : i32
    %c0_i32_45 = arith.constant 0 : i32
    %109 = arith.cmpi sge, %108, %c0_i32_45 : i32
    %c8_i32_46 = arith.constant 8 : i32
    %110 = arith.cmpi slt, %108, %c8_i32_46 : i32
    %111 = arith.andi %109, %110 : i1
    %c0_i32_47 = arith.constant 0 : i32
    %c7_i32_48 = arith.constant 7 : i32
    %112 = arith.maxsi %c0_i32_47, %108 : i32
    %113 = arith.minsi %c7_i32_48, %112 : i32
    %114 = arith.truncf %45 : vector<8x32xf32> to vector<8x32xbf16>
    %cst_49 = arith.constant dense<0.000000e+00> : vector<8x128xf32>
    %115 = tpu.matmul %114, %7, %cst_49 {dimension_numbers = #tpu.dot_dimension_numbers<[1], [0], [0], [1], [0, 0, 1, 1], [], []>} : vector<8x32xbf16>, vector<32x128xbf16>, vector<8x128xf32> -> vector<8x128xf32>
    %116 = arith.addf %115, %12 : vector<8x128xf32>
    %117 = arith.truncf %74 : vector<8x32xf32> to vector<8x32xbf16>
    %cst_50 = arith.constant dense<0.000000e+00> : vector<8x128xf32>
    %118 = tpu.matmul %117, %9, %cst_50 {dimension_numbers = #tpu.dot_dimension_numbers<[1], [0], [0], [1], [0, 0, 1, 1], [], []>} : vector<8x32xbf16>, vector<32x128xbf16>, vector<8x128xf32> -> vector<8x128xf32>
    %119 = arith.addf %116, %118 : vector<8x128xf32>
    %120 = arith.negf %119 : vector<8x128xf32>
    %121 = math.exp %120 : vector<8x128xf32>
    %cst_51 = arith.constant 1.000000e+00 : f32
    %122 = vector.broadcast %cst_51 : f32 to vector<8x128xf32>
    %123 = arith.addf %122, %121 : vector<8x128xf32>
    %124 = arith.divf %122, %123 : vector<8x128xf32>
    %125 = math.tanh %119 : vector<8x128xf32>
    %126 = vector.extract_strided_slice %124 {offsets = [0, 0], sizes = [8, 32], strides = [1, 1]} : vector<8x128xf32> to vector<8x32xf32>
    %127 = vector.extract_strided_slice %124 {offsets = [0, 32], sizes = [8, 32], strides = [1, 1]} : vector<8x128xf32> to vector<8x32xf32>
    %128 = vector.extract_strided_slice %125 {offsets = [0, 64], sizes = [8, 32], strides = [1, 1]} : vector<8x128xf32> to vector<8x32xf32>
    %129 = vector.extract_strided_slice %124 {offsets = [0, 96], sizes = [8, 32], strides = [1, 1]} : vector<8x128xf32> to vector<8x32xf32>
    %130 = arith.mulf %127, %75 : vector<8x32xf32>
    %131 = arith.mulf %126, %128 : vector<8x32xf32>
    %132 = arith.addf %130, %131 : vector<8x32xf32>
    %133 = math.tanh %132 : vector<8x32xf32>
    %134 = arith.mulf %129, %133 : vector<8x32xf32>
    %135 = arith.select %111, %134, %74 : vector<8x32xf32>
    %136 = arith.select %111, %132, %75 : vector<8x32xf32>
    %137 = arith.extui %111 : i1 to i32
    %c0_i32_52 = arith.constant 0 : i32
    %138 = arith.cmpi ne, %137, %c0_i32_52 : i32
    scf.if %138 {
      %c8_i32_197 = arith.constant 8 : i32
      %582 = arith.muli %113, %c8_i32_197 : i32
      %583 = tpu.assume_multiple %582, 8 : i32
      %584 = arith.index_cast %583 : i32 to index
      %c0_198 = arith.constant 0 : index
      %585 = vector.load %arg12[%584, %c0_198] : memref<64x32xf32, #tpu.memory_space<vmem>>, vector<8x32xf32>
      tpu.vector_store %arg12[%584, %c0_198], %134 {strides = array<i32>} : memref<64x32xf32, #tpu.memory_space<vmem>>, vector<8x32xf32>,
    } else {
    }
    %c2_i32 = arith.constant 2 : i32
    %c0_i32_53 = arith.constant 0 : i32
    %139 = arith.subi %c2_i32, %c0_i32_53 : i32
    %c0_i32_54 = arith.constant 0 : i32
    %140 = arith.cmpi sge, %139, %c0_i32_54 : i32
    %c8_i32_55 = arith.constant 8 : i32
    %141 = arith.cmpi slt, %139, %c8_i32_55 : i32
    %142 = arith.andi %140, %141 : i1
    %c0_i32_56 = arith.constant 0 : i32
    %c7_i32_57 = arith.constant 7 : i32
    %143 = arith.maxsi %c0_i32_56, %139 : i32
    %144 = arith.minsi %c7_i32_57, %143 : i32
    %c8_i32_58 = arith.constant 8 : i32
    %145 = arith.muli %144, %c8_i32_58 : i32
    %146 = tpu.assume_multiple %145, 8 : i32
    %147 = arith.index_cast %146 : i32 to index
    %c0_59 = arith.constant 0 : index
    %148 = vector.load %arg11[%147, %c0_59] : memref<64x128xf32, #tpu.memory_space<vmem>>, vector<8x128xf32>
    %149 = arith.truncf %106 : vector<8x32xf32> to vector<8x32xbf16>
    %cst_60 = arith.constant dense<0.000000e+00> : vector<8x128xf32>
    %150 = tpu.matmul %149, %8, %cst_60 {dimension_numbers = #tpu.dot_dimension_numbers<[1], [0], [0], [1], [0, 0, 1, 1], [], []>} : vector<8x32xbf16>, vector<32x128xbf16>, vector<8x128xf32> -> vector<8x128xf32>
    %151 = arith.addf %148, %150 : vector<8x128xf32>
    %152 = arith.negf %151 : vector<8x128xf32>
    %153 = math.exp %152 : vector<8x128xf32>
    %cst_61 = arith.constant 1.000000e+00 : f32
    %154 = vector.broadcast %cst_61 : f32 to vector<8x128xf32>
    %155 = arith.addf %154, %153 : vector<8x128xf32>
    %156 = arith.divf %154, %155 : vector<8x128xf32>
    %157 = math.tanh %151 : vector<8x128xf32>
    %158 = vector.extract_strided_slice %156 {offsets = [0, 0], sizes = [8, 32], strides = [1, 1]} : vector<8x128xf32> to vector<8x32xf32>
    %159 = vector.extract_strided_slice %156 {offsets = [0, 32], sizes = [8, 32], strides = [1, 1]} : vector<8x128xf32> to vector<8x32xf32>
    %160 = vector.extract_strided_slice %157 {offsets = [0, 64], sizes = [8, 32], strides = [1, 1]} : vector<8x128xf32> to vector<8x32xf32>
    %161 = vector.extract_strided_slice %156 {offsets = [0, 96], sizes = [8, 32], strides = [1, 1]} : vector<8x128xf32> to vector<8x32xf32>
    %162 = arith.mulf %159, %107 : vector<8x32xf32>
    %163 = arith.mulf %158, %160 : vector<8x32xf32>
    %164 = arith.addf %162, %163 : vector<8x32xf32>
    %165 = math.tanh %164 : vector<8x32xf32>
    %166 = arith.mulf %161, %165 : vector<8x32xf32>
    %167 = arith.select %142, %166, %106 : vector<8x32xf32>
    %168 = arith.select %142, %164, %107 : vector<8x32xf32>
    %c1_i32_62 = arith.constant 1 : i32
    %169 = arith.subi %c2_i32, %c1_i32_62 : i32
    %c0_i32_63 = arith.constant 0 : i32
    %170 = arith.cmpi sge, %169, %c0_i32_63 : i32
    %c8_i32_64 = arith.constant 8 : i32
    %171 = arith.cmpi slt, %169, %c8_i32_64 : i32
    %172 = arith.andi %170, %171 : i1
    %c0_i32_65 = arith.constant 0 : i32
    %c7_i32_66 = arith.constant 7 : i32
    %173 = arith.maxsi %c0_i32_65, %169 : i32
    %174 = arith.minsi %c7_i32_66, %173 : i32
    %175 = arith.truncf %106 : vector<8x32xf32> to vector<8x32xbf16>
    %cst_67 = arith.constant dense<0.000000e+00> : vector<8x128xf32>
    %176 = tpu.matmul %175, %7, %cst_67 {dimension_numbers = #tpu.dot_dimension_numbers<[1], [0], [0], [1], [0, 0, 1, 1], [], []>} : vector<8x32xbf16>, vector<32x128xbf16>, vector<8x128xf32> -> vector<8x128xf32>
    %177 = arith.addf %176, %12 : vector<8x128xf32>
    %178 = arith.truncf %135 : vector<8x32xf32> to vector<8x32xbf16>
    %cst_68 = arith.constant dense<0.000000e+00> : vector<8x128xf32>
    %179 = tpu.matmul %178, %9, %cst_68 {dimension_numbers = #tpu.dot_dimension_numbers<[1], [0], [0], [1], [0, 0, 1, 1], [], []>} : vector<8x32xbf16>, vector<32x128xbf16>, vector<8x128xf32> -> vector<8x128xf32>
    %180 = arith.addf %177, %179 : vector<8x128xf32>
    %181 = arith.negf %180 : vector<8x128xf32>
    %182 = math.exp %181 : vector<8x128xf32>
    %cst_69 = arith.constant 1.000000e+00 : f32
    %183 = vector.broadcast %cst_69 : f32 to vector<8x128xf32>
    %184 = arith.addf %183, %182 : vector<8x128xf32>
    %185 = arith.divf %183, %184 : vector<8x128xf32>
    %186 = math.tanh %180 : vector<8x128xf32>
    %187 = vector.extract_strided_slice %185 {offsets = [0, 0], sizes = [8, 32], strides = [1, 1]} : vector<8x128xf32> to vector<8x32xf32>
    %188 = vector.extract_strided_slice %185 {offsets = [0, 32], sizes = [8, 32], strides = [1, 1]} : vector<8x128xf32> to vector<8x32xf32>
    %189 = vector.extract_strided_slice %186 {offsets = [0, 64], sizes = [8, 32], strides = [1, 1]} : vector<8x128xf32> to vector<8x32xf32>
    %190 = vector.extract_strided_slice %185 {offsets = [0, 96], sizes = [8, 32], strides = [1, 1]} : vector<8x128xf32> to vector<8x32xf32>
    %191 = arith.mulf %188, %136 : vector<8x32xf32>
    %192 = arith.mulf %187, %189 : vector<8x32xf32>
    %193 = arith.addf %191, %192 : vector<8x32xf32>
    %194 = math.tanh %193 : vector<8x32xf32>
    %195 = arith.mulf %190, %194 : vector<8x32xf32>
    %196 = arith.select %172, %195, %135 : vector<8x32xf32>
    %197 = arith.select %172, %193, %136 : vector<8x32xf32>
    %198 = arith.extui %172 : i1 to i32
    %c0_i32_70 = arith.constant 0 : i32
    %199 = arith.cmpi ne, %198, %c0_i32_70 : i32
    scf.if %199 {
      %c8_i32_197 = arith.constant 8 : i32
      %582 = arith.muli %174, %c8_i32_197 : i32
      %583 = tpu.assume_multiple %582, 8 : i32
      %584 = arith.index_cast %583 : i32 to index
      %c0_198 = arith.constant 0 : index
      %585 = vector.load %arg12[%584, %c0_198] : memref<64x32xf32, #tpu.memory_space<vmem>>, vector<8x32xf32>
      tpu.vector_store %arg12[%584, %c0_198], %195 {strides = array<i32>} : memref<64x32xf32, #tpu.memory_space<vmem>>, vector<8x32xf32>,
    } else {
    }
    %c3_i32 = arith.constant 3 : i32
    %c0_i32_71 = arith.constant 0 : i32
    %200 = arith.subi %c3_i32, %c0_i32_71 : i32
    %c0_i32_72 = arith.constant 0 : i32
    %201 = arith.cmpi sge, %200, %c0_i32_72 : i32
    %c8_i32_73 = arith.constant 8 : i32
    %202 = arith.cmpi slt, %200, %c8_i32_73 : i32
    %203 = arith.andi %201, %202 : i1
    %c0_i32_74 = arith.constant 0 : i32
    %c7_i32_75 = arith.constant 7 : i32
    %204 = arith.maxsi %c0_i32_74, %200 : i32
    %205 = arith.minsi %c7_i32_75, %204 : i32
    %c8_i32_76 = arith.constant 8 : i32
    %206 = arith.muli %205, %c8_i32_76 : i32
    %207 = tpu.assume_multiple %206, 8 : i32
    %208 = arith.index_cast %207 : i32 to index
    %c0_77 = arith.constant 0 : index
    %209 = vector.load %arg11[%208, %c0_77] : memref<64x128xf32, #tpu.memory_space<vmem>>, vector<8x128xf32>
    %210 = arith.truncf %167 : vector<8x32xf32> to vector<8x32xbf16>
    %cst_78 = arith.constant dense<0.000000e+00> : vector<8x128xf32>
    %211 = tpu.matmul %210, %8, %cst_78 {dimension_numbers = #tpu.dot_dimension_numbers<[1], [0], [0], [1], [0, 0, 1, 1], [], []>} : vector<8x32xbf16>, vector<32x128xbf16>, vector<8x128xf32> -> vector<8x128xf32>
    %212 = arith.addf %209, %211 : vector<8x128xf32>
    %213 = arith.negf %212 : vector<8x128xf32>
    %214 = math.exp %213 : vector<8x128xf32>
    %cst_79 = arith.constant 1.000000e+00 : f32
    %215 = vector.broadcast %cst_79 : f32 to vector<8x128xf32>
    %216 = arith.addf %215, %214 : vector<8x128xf32>
    %217 = arith.divf %215, %216 : vector<8x128xf32>
    %218 = math.tanh %212 : vector<8x128xf32>
    %219 = vector.extract_strided_slice %217 {offsets = [0, 0], sizes = [8, 32], strides = [1, 1]} : vector<8x128xf32> to vector<8x32xf32>
    %220 = vector.extract_strided_slice %217 {offsets = [0, 32], sizes = [8, 32], strides = [1, 1]} : vector<8x128xf32> to vector<8x32xf32>
    %221 = vector.extract_strided_slice %218 {offsets = [0, 64], sizes = [8, 32], strides = [1, 1]} : vector<8x128xf32> to vector<8x32xf32>
    %222 = vector.extract_strided_slice %217 {offsets = [0, 96], sizes = [8, 32], strides = [1, 1]} : vector<8x128xf32> to vector<8x32xf32>
    %223 = arith.mulf %220, %168 : vector<8x32xf32>
    %224 = arith.mulf %219, %221 : vector<8x32xf32>
    %225 = arith.addf %223, %224 : vector<8x32xf32>
    %226 = math.tanh %225 : vector<8x32xf32>
    %227 = arith.mulf %222, %226 : vector<8x32xf32>
    %228 = arith.select %203, %227, %167 : vector<8x32xf32>
    %229 = arith.select %203, %225, %168 : vector<8x32xf32>
    %c1_i32_80 = arith.constant 1 : i32
    %230 = arith.subi %c3_i32, %c1_i32_80 : i32
    %c0_i32_81 = arith.constant 0 : i32
    %231 = arith.cmpi sge, %230, %c0_i32_81 : i32
    %c8_i32_82 = arith.constant 8 : i32
    %232 = arith.cmpi slt, %230, %c8_i32_82 : i32
    %233 = arith.andi %231, %232 : i1
    %c0_i32_83 = arith.constant 0 : i32
    %c7_i32_84 = arith.constant 7 : i32
    %234 = arith.maxsi %c0_i32_83, %230 : i32
    %235 = arith.minsi %c7_i32_84, %234 : i32
    %236 = arith.truncf %167 : vector<8x32xf32> to vector<8x32xbf16>
    %cst_85 = arith.constant dense<0.000000e+00> : vector<8x128xf32>
    %237 = tpu.matmul %236, %7, %cst_85 {dimension_numbers = #tpu.dot_dimension_numbers<[1], [0], [0], [1], [0, 0, 1, 1], [], []>} : vector<8x32xbf16>, vector<32x128xbf16>, vector<8x128xf32> -> vector<8x128xf32>
    %238 = arith.addf %237, %12 : vector<8x128xf32>
    %239 = arith.truncf %196 : vector<8x32xf32> to vector<8x32xbf16>
    %cst_86 = arith.constant dense<0.000000e+00> : vector<8x128xf32>
    %240 = tpu.matmul %239, %9, %cst_86 {dimension_numbers = #tpu.dot_dimension_numbers<[1], [0], [0], [1], [0, 0, 1, 1], [], []>} : vector<8x32xbf16>, vector<32x128xbf16>, vector<8x128xf32> -> vector<8x128xf32>
    %241 = arith.addf %238, %240 : vector<8x128xf32>
    %242 = arith.negf %241 : vector<8x128xf32>
    %243 = math.exp %242 : vector<8x128xf32>
    %cst_87 = arith.constant 1.000000e+00 : f32
    %244 = vector.broadcast %cst_87 : f32 to vector<8x128xf32>
    %245 = arith.addf %244, %243 : vector<8x128xf32>
    %246 = arith.divf %244, %245 : vector<8x128xf32>
    %247 = math.tanh %241 : vector<8x128xf32>
    %248 = vector.extract_strided_slice %246 {offsets = [0, 0], sizes = [8, 32], strides = [1, 1]} : vector<8x128xf32> to vector<8x32xf32>
    %249 = vector.extract_strided_slice %246 {offsets = [0, 32], sizes = [8, 32], strides = [1, 1]} : vector<8x128xf32> to vector<8x32xf32>
    %250 = vector.extract_strided_slice %247 {offsets = [0, 64], sizes = [8, 32], strides = [1, 1]} : vector<8x128xf32> to vector<8x32xf32>
    %251 = vector.extract_strided_slice %246 {offsets = [0, 96], sizes = [8, 32], strides = [1, 1]} : vector<8x128xf32> to vector<8x32xf32>
    %252 = arith.mulf %249, %197 : vector<8x32xf32>
    %253 = arith.mulf %248, %250 : vector<8x32xf32>
    %254 = arith.addf %252, %253 : vector<8x32xf32>
    %255 = math.tanh %254 : vector<8x32xf32>
    %256 = arith.mulf %251, %255 : vector<8x32xf32>
    %257 = arith.select %233, %256, %196 : vector<8x32xf32>
    %258 = arith.select %233, %254, %197 : vector<8x32xf32>
    %259 = arith.extui %233 : i1 to i32
    %c0_i32_88 = arith.constant 0 : i32
    %260 = arith.cmpi ne, %259, %c0_i32_88 : i32
    scf.if %260 {
      %c8_i32_197 = arith.constant 8 : i32
      %582 = arith.muli %235, %c8_i32_197 : i32
      %583 = tpu.assume_multiple %582, 8 : i32
      %584 = arith.index_cast %583 : i32 to index
      %c0_198 = arith.constant 0 : index
      %585 = vector.load %arg12[%584, %c0_198] : memref<64x32xf32, #tpu.memory_space<vmem>>, vector<8x32xf32>
      tpu.vector_store %arg12[%584, %c0_198], %256 {strides = array<i32>} : memref<64x32xf32, #tpu.memory_space<vmem>>, vector<8x32xf32>,
    } else {
    }
    %c4_i32 = arith.constant 4 : i32
    %c0_i32_89 = arith.constant 0 : i32
    %261 = arith.subi %c4_i32, %c0_i32_89 : i32
    %c0_i32_90 = arith.constant 0 : i32
    %262 = arith.cmpi sge, %261, %c0_i32_90 : i32
    %c8_i32_91 = arith.constant 8 : i32
    %263 = arith.cmpi slt, %261, %c8_i32_91 : i32
    %264 = arith.andi %262, %263 : i1
    %c0_i32_92 = arith.constant 0 : i32
    %c7_i32_93 = arith.constant 7 : i32
    %265 = arith.maxsi %c0_i32_92, %261 : i32
    %266 = arith.minsi %c7_i32_93, %265 : i32
    %c8_i32_94 = arith.constant 8 : i32
    %267 = arith.muli %266, %c8_i32_94 : i32
    %268 = tpu.assume_multiple %267, 8 : i32
    %269 = arith.index_cast %268 : i32 to index
    %c0_95 = arith.constant 0 : index
    %270 = vector.load %arg11[%269, %c0_95] : memref<64x128xf32, #tpu.memory_space<vmem>>, vector<8x128xf32>
    %271 = arith.truncf %228 : vector<8x32xf32> to vector<8x32xbf16>
    %cst_96 = arith.constant dense<0.000000e+00> : vector<8x128xf32>
    %272 = tpu.matmul %271, %8, %cst_96 {dimension_numbers = #tpu.dot_dimension_numbers<[1], [0], [0], [1], [0, 0, 1, 1], [], []>} : vector<8x32xbf16>, vector<32x128xbf16>, vector<8x128xf32> -> vector<8x128xf32>
    %273 = arith.addf %270, %272 : vector<8x128xf32>
    %274 = arith.negf %273 : vector<8x128xf32>
    %275 = math.exp %274 : vector<8x128xf32>
    %cst_97 = arith.constant 1.000000e+00 : f32
    %276 = vector.broadcast %cst_97 : f32 to vector<8x128xf32>
    %277 = arith.addf %276, %275 : vector<8x128xf32>
    %278 = arith.divf %276, %277 : vector<8x128xf32>
    %279 = math.tanh %273 : vector<8x128xf32>
    %280 = vector.extract_strided_slice %278 {offsets = [0, 0], sizes = [8, 32], strides = [1, 1]} : vector<8x128xf32> to vector<8x32xf32>
    %281 = vector.extract_strided_slice %278 {offsets = [0, 32], sizes = [8, 32], strides = [1, 1]} : vector<8x128xf32> to vector<8x32xf32>
    %282 = vector.extract_strided_slice %279 {offsets = [0, 64], sizes = [8, 32], strides = [1, 1]} : vector<8x128xf32> to vector<8x32xf32>
    %283 = vector.extract_strided_slice %278 {offsets = [0, 96], sizes = [8, 32], strides = [1, 1]} : vector<8x128xf32> to vector<8x32xf32>
    %284 = arith.mulf %281, %229 : vector<8x32xf32>
    %285 = arith.mulf %280, %282 : vector<8x32xf32>
    %286 = arith.addf %284, %285 : vector<8x32xf32>
    %287 = math.tanh %286 : vector<8x32xf32>
    %288 = arith.mulf %283, %287 : vector<8x32xf32>
    %289 = arith.select %264, %288, %228 : vector<8x32xf32>
    %290 = arith.select %264, %286, %229 : vector<8x32xf32>
    %c1_i32_98 = arith.constant 1 : i32
    %291 = arith.subi %c4_i32, %c1_i32_98 : i32
    %c0_i32_99 = arith.constant 0 : i32
    %292 = arith.cmpi sge, %291, %c0_i32_99 : i32
    %c8_i32_100 = arith.constant 8 : i32
    %293 = arith.cmpi slt, %291, %c8_i32_100 : i32
    %294 = arith.andi %292, %293 : i1
    %c0_i32_101 = arith.constant 0 : i32
    %c7_i32_102 = arith.constant 7 : i32
    %295 = arith.maxsi %c0_i32_101, %291 : i32
    %296 = arith.minsi %c7_i32_102, %295 : i32
    %297 = arith.truncf %228 : vector<8x32xf32> to vector<8x32xbf16>
    %cst_103 = arith.constant dense<0.000000e+00> : vector<8x128xf32>
    %298 = tpu.matmul %297, %7, %cst_103 {dimension_numbers = #tpu.dot_dimension_numbers<[1], [0], [0], [1], [0, 0, 1, 1], [], []>} : vector<8x32xbf16>, vector<32x128xbf16>, vector<8x128xf32> -> vector<8x128xf32>
    %299 = arith.addf %298, %12 : vector<8x128xf32>
    %300 = arith.truncf %257 : vector<8x32xf32> to vector<8x32xbf16>
    %cst_104 = arith.constant dense<0.000000e+00> : vector<8x128xf32>
    %301 = tpu.matmul %300, %9, %cst_104 {dimension_numbers = #tpu.dot_dimension_numbers<[1], [0], [0], [1], [0, 0, 1, 1], [], []>} : vector<8x32xbf16>, vector<32x128xbf16>, vector<8x128xf32> -> vector<8x128xf32>
    %302 = arith.addf %299, %301 : vector<8x128xf32>
    %303 = arith.negf %302 : vector<8x128xf32>
    %304 = math.exp %303 : vector<8x128xf32>
    %cst_105 = arith.constant 1.000000e+00 : f32
    %305 = vector.broadcast %cst_105 : f32 to vector<8x128xf32>
    %306 = arith.addf %305, %304 : vector<8x128xf32>
    %307 = arith.divf %305, %306 : vector<8x128xf32>
    %308 = math.tanh %302 : vector<8x128xf32>
    %309 = vector.extract_strided_slice %307 {offsets = [0, 0], sizes = [8, 32], strides = [1, 1]} : vector<8x128xf32> to vector<8x32xf32>
    %310 = vector.extract_strided_slice %307 {offsets = [0, 32], sizes = [8, 32], strides = [1, 1]} : vector<8x128xf32> to vector<8x32xf32>
    %311 = vector.extract_strided_slice %308 {offsets = [0, 64], sizes = [8, 32], strides = [1, 1]} : vector<8x128xf32> to vector<8x32xf32>
    %312 = vector.extract_strided_slice %307 {offsets = [0, 96], sizes = [8, 32], strides = [1, 1]} : vector<8x128xf32> to vector<8x32xf32>
    %313 = arith.mulf %310, %258 : vector<8x32xf32>
    %314 = arith.mulf %309, %311 : vector<8x32xf32>
    %315 = arith.addf %313, %314 : vector<8x32xf32>
    %316 = math.tanh %315 : vector<8x32xf32>
    %317 = arith.mulf %312, %316 : vector<8x32xf32>
    %318 = arith.select %294, %317, %257 : vector<8x32xf32>
    %319 = arith.select %294, %315, %258 : vector<8x32xf32>
    %320 = arith.extui %294 : i1 to i32
    %c0_i32_106 = arith.constant 0 : i32
    %321 = arith.cmpi ne, %320, %c0_i32_106 : i32
    scf.if %321 {
      %c8_i32_197 = arith.constant 8 : i32
      %582 = arith.muli %296, %c8_i32_197 : i32
      %583 = tpu.assume_multiple %582, 8 : i32
      %584 = arith.index_cast %583 : i32 to index
      %c0_198 = arith.constant 0 : index
      %585 = vector.load %arg12[%584, %c0_198] : memref<64x32xf32, #tpu.memory_space<vmem>>, vector<8x32xf32>
      tpu.vector_store %arg12[%584, %c0_198], %317 {strides = array<i32>} : memref<64x32xf32, #tpu.memory_space<vmem>>, vector<8x32xf32>,
    } else {
    }
    %c5_i32 = arith.constant 5 : i32
    %c0_i32_107 = arith.constant 0 : i32
    %322 = arith.subi %c5_i32, %c0_i32_107 : i32
    %c0_i32_108 = arith.constant 0 : i32
    %323 = arith.cmpi sge, %322, %c0_i32_108 : i32
    %c8_i32_109 = arith.constant 8 : i32
    %324 = arith.cmpi slt, %322, %c8_i32_109 : i32
    %325 = arith.andi %323, %324 : i1
    %c0_i32_110 = arith.constant 0 : i32
    %c7_i32_111 = arith.constant 7 : i32
    %326 = arith.maxsi %c0_i32_110, %322 : i32
    %327 = arith.minsi %c7_i32_111, %326 : i32
    %c8_i32_112 = arith.constant 8 : i32
    %328 = arith.muli %327, %c8_i32_112 : i32
    %329 = tpu.assume_multiple %328, 8 : i32
    %330 = arith.index_cast %329 : i32 to index
    %c0_113 = arith.constant 0 : index
    %331 = vector.load %arg11[%330, %c0_113] : memref<64x128xf32, #tpu.memory_space<vmem>>, vector<8x128xf32>
    %332 = arith.truncf %289 : vector<8x32xf32> to vector<8x32xbf16>
    %cst_114 = arith.constant dense<0.000000e+00> : vector<8x128xf32>
    %333 = tpu.matmul %332, %8, %cst_114 {dimension_numbers = #tpu.dot_dimension_numbers<[1], [0], [0], [1], [0, 0, 1, 1], [], []>} : vector<8x32xbf16>, vector<32x128xbf16>, vector<8x128xf32> -> vector<8x128xf32>
    %334 = arith.addf %331, %333 : vector<8x128xf32>
    %335 = arith.negf %334 : vector<8x128xf32>
    %336 = math.exp %335 : vector<8x128xf32>
    %cst_115 = arith.constant 1.000000e+00 : f32
    %337 = vector.broadcast %cst_115 : f32 to vector<8x128xf32>
    %338 = arith.addf %337, %336 : vector<8x128xf32>
    %339 = arith.divf %337, %338 : vector<8x128xf32>
    %340 = math.tanh %334 : vector<8x128xf32>
    %341 = vector.extract_strided_slice %339 {offsets = [0, 0], sizes = [8, 32], strides = [1, 1]} : vector<8x128xf32> to vector<8x32xf32>
    %342 = vector.extract_strided_slice %339 {offsets = [0, 32], sizes = [8, 32], strides = [1, 1]} : vector<8x128xf32> to vector<8x32xf32>
    %343 = vector.extract_strided_slice %340 {offsets = [0, 64], sizes = [8, 32], strides = [1, 1]} : vector<8x128xf32> to vector<8x32xf32>
    %344 = vector.extract_strided_slice %339 {offsets = [0, 96], sizes = [8, 32], strides = [1, 1]} : vector<8x128xf32> to vector<8x32xf32>
    %345 = arith.mulf %342, %290 : vector<8x32xf32>
    %346 = arith.mulf %341, %343 : vector<8x32xf32>
    %347 = arith.addf %345, %346 : vector<8x32xf32>
    %348 = math.tanh %347 : vector<8x32xf32>
    %349 = arith.mulf %344, %348 : vector<8x32xf32>
    %350 = arith.select %325, %349, %289 : vector<8x32xf32>
    %351 = arith.select %325, %347, %290 : vector<8x32xf32>
    %c1_i32_116 = arith.constant 1 : i32
    %352 = arith.subi %c5_i32, %c1_i32_116 : i32
    %c0_i32_117 = arith.constant 0 : i32
    %353 = arith.cmpi sge, %352, %c0_i32_117 : i32
    %c8_i32_118 = arith.constant 8 : i32
    %354 = arith.cmpi slt, %352, %c8_i32_118 : i32
    %355 = arith.andi %353, %354 : i1
    %c0_i32_119 = arith.constant 0 : i32
    %c7_i32_120 = arith.constant 7 : i32
    %356 = arith.maxsi %c0_i32_119, %352 : i32
    %357 = arith.minsi %c7_i32_120, %356 : i32
    %358 = arith.truncf %289 : vector<8x32xf32> to vector<8x32xbf16>
    %cst_121 = arith.constant dense<0.000000e+00> : vector<8x128xf32>
    %359 = tpu.matmul %358, %7, %cst_121 {dimension_numbers = #tpu.dot_dimension_numbers<[1], [0], [0], [1], [0, 0, 1, 1], [], []>} : vector<8x32xbf16>, vector<32x128xbf16>, vector<8x128xf32> -> vector<8x128xf32>
    %360 = arith.addf %359, %12 : vector<8x128xf32>
    %361 = arith.truncf %318 : vector<8x32xf32> to vector<8x32xbf16>
    %cst_122 = arith.constant dense<0.000000e+00> : vector<8x128xf32>
    %362 = tpu.matmul %361, %9, %cst_122 {dimension_numbers = #tpu.dot_dimension_numbers<[1], [0], [0], [1], [0, 0, 1, 1], [], []>} : vector<8x32xbf16>, vector<32x128xbf16>, vector<8x128xf32> -> vector<8x128xf32>
    %363 = arith.addf %360, %362 : vector<8x128xf32>
    %364 = arith.negf %363 : vector<8x128xf32>
    %365 = math.exp %364 : vector<8x128xf32>
    %cst_123 = arith.constant 1.000000e+00 : f32
    %366 = vector.broadcast %cst_123 : f32 to vector<8x128xf32>
    %367 = arith.addf %366, %365 : vector<8x128xf32>
    %368 = arith.divf %366, %367 : vector<8x128xf32>
    %369 = math.tanh %363 : vector<8x128xf32>
    %370 = vector.extract_strided_slice %368 {offsets = [0, 0], sizes = [8, 32], strides = [1, 1]} : vector<8x128xf32> to vector<8x32xf32>
    %371 = vector.extract_strided_slice %368 {offsets = [0, 32], sizes = [8, 32], strides = [1, 1]} : vector<8x128xf32> to vector<8x32xf32>
    %372 = vector.extract_strided_slice %369 {offsets = [0, 64], sizes = [8, 32], strides = [1, 1]} : vector<8x128xf32> to vector<8x32xf32>
    %373 = vector.extract_strided_slice %368 {offsets = [0, 96], sizes = [8, 32], strides = [1, 1]} : vector<8x128xf32> to vector<8x32xf32>
    %374 = arith.mulf %371, %319 : vector<8x32xf32>
    %375 = arith.mulf %370, %372 : vector<8x32xf32>
    %376 = arith.addf %374, %375 : vector<8x32xf32>
    %377 = math.tanh %376 : vector<8x32xf32>
    %378 = arith.mulf %373, %377 : vector<8x32xf32>
    %379 = arith.select %355, %378, %318 : vector<8x32xf32>
    %380 = arith.select %355, %376, %319 : vector<8x32xf32>
    %381 = arith.extui %355 : i1 to i32
    %c0_i32_124 = arith.constant 0 : i32
    %382 = arith.cmpi ne, %381, %c0_i32_124 : i32
    scf.if %382 {
      %c8_i32_197 = arith.constant 8 : i32
      %582 = arith.muli %357, %c8_i32_197 : i32
      %583 = tpu.assume_multiple %582, 8 : i32
      %584 = arith.index_cast %583 : i32 to index
      %c0_198 = arith.constant 0 : index
      %585 = vector.load %arg12[%584, %c0_198] : memref<64x32xf32, #tpu.memory_space<vmem>>, vector<8x32xf32>
      tpu.vector_store %arg12[%584, %c0_198], %378 {strides = array<i32>} : memref<64x32xf32, #tpu.memory_space<vmem>>, vector<8x32xf32>,
    } else {
    }
    %c6_i32 = arith.constant 6 : i32
    %c0_i32_125 = arith.constant 0 : i32
    %383 = arith.subi %c6_i32, %c0_i32_125 : i32
    %c0_i32_126 = arith.constant 0 : i32
    %384 = arith.cmpi sge, %383, %c0_i32_126 : i32
    %c8_i32_127 = arith.constant 8 : i32
    %385 = arith.cmpi slt, %383, %c8_i32_127 : i32
    %386 = arith.andi %384, %385 : i1
    %c0_i32_128 = arith.constant 0 : i32
    %c7_i32_129 = arith.constant 7 : i32
    %387 = arith.maxsi %c0_i32_128, %383 : i32
    %388 = arith.minsi %c7_i32_129, %387 : i32
    %c8_i32_130 = arith.constant 8 : i32
    %389 = arith.muli %388, %c8_i32_130 : i32
    %390 = tpu.assume_multiple %389, 8 : i32
    %391 = arith.index_cast %390 : i32 to index
    %c0_131 = arith.constant 0 : index
    %392 = vector.load %arg11[%391, %c0_131] : memref<64x128xf32, #tpu.memory_space<vmem>>, vector<8x128xf32>
    %393 = arith.truncf %350 : vector<8x32xf32> to vector<8x32xbf16>
    %cst_132 = arith.constant dense<0.000000e+00> : vector<8x128xf32>
    %394 = tpu.matmul %393, %8, %cst_132 {dimension_numbers = #tpu.dot_dimension_numbers<[1], [0], [0], [1], [0, 0, 1, 1], [], []>} : vector<8x32xbf16>, vector<32x128xbf16>, vector<8x128xf32> -> vector<8x128xf32>
    %395 = arith.addf %392, %394 : vector<8x128xf32>
    %396 = arith.negf %395 : vector<8x128xf32>
    %397 = math.exp %396 : vector<8x128xf32>
    %cst_133 = arith.constant 1.000000e+00 : f32
    %398 = vector.broadcast %cst_133 : f32 to vector<8x128xf32>
    %399 = arith.addf %398, %397 : vector<8x128xf32>
    %400 = arith.divf %398, %399 : vector<8x128xf32>
    %401 = math.tanh %395 : vector<8x128xf32>
    %402 = vector.extract_strided_slice %400 {offsets = [0, 0], sizes = [8, 32], strides = [1, 1]} : vector<8x128xf32> to vector<8x32xf32>
    %403 = vector.extract_strided_slice %400 {offsets = [0, 32], sizes = [8, 32], strides = [1, 1]} : vector<8x128xf32> to vector<8x32xf32>
    %404 = vector.extract_strided_slice %401 {offsets = [0, 64], sizes = [8, 32], strides = [1, 1]} : vector<8x128xf32> to vector<8x32xf32>
    %405 = vector.extract_strided_slice %400 {offsets = [0, 96], sizes = [8, 32], strides = [1, 1]} : vector<8x128xf32> to vector<8x32xf32>
    %406 = arith.mulf %403, %351 : vector<8x32xf32>
    %407 = arith.mulf %402, %404 : vector<8x32xf32>
    %408 = arith.addf %406, %407 : vector<8x32xf32>
    %409 = math.tanh %408 : vector<8x32xf32>
    %410 = arith.mulf %405, %409 : vector<8x32xf32>
    %411 = arith.select %386, %410, %350 : vector<8x32xf32>
    %412 = arith.select %386, %408, %351 : vector<8x32xf32>
    %c1_i32_134 = arith.constant 1 : i32
    %413 = arith.subi %c6_i32, %c1_i32_134 : i32
    %c0_i32_135 = arith.constant 0 : i32
    %414 = arith.cmpi sge, %413, %c0_i32_135 : i32
    %c8_i32_136 = arith.constant 8 : i32
    %415 = arith.cmpi slt, %413, %c8_i32_136 : i32
    %416 = arith.andi %414, %415 : i1
    %c0_i32_137 = arith.constant 0 : i32
    %c7_i32_138 = arith.constant 7 : i32
    %417 = arith.maxsi %c0_i32_137, %413 : i32
    %418 = arith.minsi %c7_i32_138, %417 : i32
    %419 = arith.truncf %350 : vector<8x32xf32> to vector<8x32xbf16>
    %cst_139 = arith.constant dense<0.000000e+00> : vector<8x128xf32>
    %420 = tpu.matmul %419, %7, %cst_139 {dimension_numbers = #tpu.dot_dimension_numbers<[1], [0], [0], [1], [0, 0, 1, 1], [], []>} : vector<8x32xbf16>, vector<32x128xbf16>, vector<8x128xf32> -> vector<8x128xf32>
    %421 = arith.addf %420, %12 : vector<8x128xf32>
    %422 = arith.truncf %379 : vector<8x32xf32> to vector<8x32xbf16>
    %cst_140 = arith.constant dense<0.000000e+00> : vector<8x128xf32>
    %423 = tpu.matmul %422, %9, %cst_140 {dimension_numbers = #tpu.dot_dimension_numbers<[1], [0], [0], [1], [0, 0, 1, 1], [], []>} : vector<8x32xbf16>, vector<32x128xbf16>, vector<8x128xf32> -> vector<8x128xf32>
    %424 = arith.addf %421, %423 : vector<8x128xf32>
    %425 = arith.negf %424 : vector<8x128xf32>
    %426 = math.exp %425 : vector<8x128xf32>
    %cst_141 = arith.constant 1.000000e+00 : f32
    %427 = vector.broadcast %cst_141 : f32 to vector<8x128xf32>
    %428 = arith.addf %427, %426 : vector<8x128xf32>
    %429 = arith.divf %427, %428 : vector<8x128xf32>
    %430 = math.tanh %424 : vector<8x128xf32>
    %431 = vector.extract_strided_slice %429 {offsets = [0, 0], sizes = [8, 32], strides = [1, 1]} : vector<8x128xf32> to vector<8x32xf32>
    %432 = vector.extract_strided_slice %429 {offsets = [0, 32], sizes = [8, 32], strides = [1, 1]} : vector<8x128xf32> to vector<8x32xf32>
    %433 = vector.extract_strided_slice %430 {offsets = [0, 64], sizes = [8, 32], strides = [1, 1]} : vector<8x128xf32> to vector<8x32xf32>
    %434 = vector.extract_strided_slice %429 {offsets = [0, 96], sizes = [8, 32], strides = [1, 1]} : vector<8x128xf32> to vector<8x32xf32>
    %435 = arith.mulf %432, %380 : vector<8x32xf32>
    %436 = arith.mulf %431, %433 : vector<8x32xf32>
    %437 = arith.addf %435, %436 : vector<8x32xf32>
    %438 = math.tanh %437 : vector<8x32xf32>
    %439 = arith.mulf %434, %438 : vector<8x32xf32>
    %440 = arith.select %416, %439, %379 : vector<8x32xf32>
    %441 = arith.select %416, %437, %380 : vector<8x32xf32>
    %442 = arith.extui %416 : i1 to i32
    %c0_i32_142 = arith.constant 0 : i32
    %443 = arith.cmpi ne, %442, %c0_i32_142 : i32
    scf.if %443 {
      %c8_i32_197 = arith.constant 8 : i32
      %582 = arith.muli %418, %c8_i32_197 : i32
      %583 = tpu.assume_multiple %582, 8 : i32
      %584 = arith.index_cast %583 : i32 to index
      %c0_198 = arith.constant 0 : index
      %585 = vector.load %arg12[%584, %c0_198] : memref<64x32xf32, #tpu.memory_space<vmem>>, vector<8x32xf32>
      tpu.vector_store %arg12[%584, %c0_198], %439 {strides = array<i32>} : memref<64x32xf32, #tpu.memory_space<vmem>>, vector<8x32xf32>,
    } else {
    }
    %c7_i32_143 = arith.constant 7 : i32
    %c0_i32_144 = arith.constant 0 : i32
    %444 = arith.subi %c7_i32_143, %c0_i32_144 : i32
    %c0_i32_145 = arith.constant 0 : i32
    %445 = arith.cmpi sge, %444, %c0_i32_145 : i32
    %c8_i32_146 = arith.constant 8 : i32
    %446 = arith.cmpi slt, %444, %c8_i32_146 : i32
    %447 = arith.andi %445, %446 : i1
    %c0_i32_147 = arith.constant 0 : i32
    %c7_i32_148 = arith.constant 7 : i32
    %448 = arith.maxsi %c0_i32_147, %444 : i32
    %449 = arith.minsi %c7_i32_148, %448 : i32
    %c8_i32_149 = arith.constant 8 : i32
    %450 = arith.muli %449, %c8_i32_149 : i32
    %451 = tpu.assume_multiple %450, 8 : i32
    %452 = arith.index_cast %451 : i32 to index
    %c0_150 = arith.constant 0 : index
    %453 = vector.load %arg11[%452, %c0_150] : memref<64x128xf32, #tpu.memory_space<vmem>>, vector<8x128xf32>
    %454 = arith.truncf %411 : vector<8x32xf32> to vector<8x32xbf16>
    %cst_151 = arith.constant dense<0.000000e+00> : vector<8x128xf32>
    %455 = tpu.matmul %454, %8, %cst_151 {dimension_numbers = #tpu.dot_dimension_numbers<[1], [0], [0], [1], [0, 0, 1, 1], [], []>} : vector<8x32xbf16>, vector<32x128xbf16>, vector<8x128xf32> -> vector<8x128xf32>
    %456 = arith.addf %453, %455 : vector<8x128xf32>
    %457 = arith.negf %456 : vector<8x128xf32>
    %458 = math.exp %457 : vector<8x128xf32>
    %cst_152 = arith.constant 1.000000e+00 : f32
    %459 = vector.broadcast %cst_152 : f32 to vector<8x128xf32>
    %460 = arith.addf %459, %458 : vector<8x128xf32>
    %461 = arith.divf %459, %460 : vector<8x128xf32>
    %462 = math.tanh %456 : vector<8x128xf32>
    %463 = vector.extract_strided_slice %461 {offsets = [0, 0], sizes = [8, 32], strides = [1, 1]} : vector<8x128xf32> to vector<8x32xf32>
    %464 = vector.extract_strided_slice %461 {offsets = [0, 32], sizes = [8, 32], strides = [1, 1]} : vector<8x128xf32> to vector<8x32xf32>
    %465 = vector.extract_strided_slice %462 {offsets = [0, 64], sizes = [8, 32], strides = [1, 1]} : vector<8x128xf32> to vector<8x32xf32>
    %466 = vector.extract_strided_slice %461 {offsets = [0, 96], sizes = [8, 32], strides = [1, 1]} : vector<8x128xf32> to vector<8x32xf32>
    %467 = arith.mulf %464, %412 : vector<8x32xf32>
    %468 = arith.mulf %463, %465 : vector<8x32xf32>
    %469 = arith.addf %467, %468 : vector<8x32xf32>
    %470 = math.tanh %469 : vector<8x32xf32>
    %471 = arith.mulf %466, %470 : vector<8x32xf32>
    %472 = arith.select %447, %471, %411 : vector<8x32xf32>
    %473 = arith.select %447, %469, %412 : vector<8x32xf32>
    %c1_i32_153 = arith.constant 1 : i32
    %474 = arith.subi %c7_i32_143, %c1_i32_153 : i32
    %c0_i32_154 = arith.constant 0 : i32
    %475 = arith.cmpi sge, %474, %c0_i32_154 : i32
    %c8_i32_155 = arith.constant 8 : i32
    %476 = arith.cmpi slt, %474, %c8_i32_155 : i32
    %477 = arith.andi %475, %476 : i1
    %c0_i32_156 = arith.constant 0 : i32
    %c7_i32_157 = arith.constant 7 : i32
    %478 = arith.maxsi %c0_i32_156, %474 : i32
    %479 = arith.minsi %c7_i32_157, %478 : i32
    %480 = arith.truncf %411 : vector<8x32xf32> to vector<8x32xbf16>
    %cst_158 = arith.constant dense<0.000000e+00> : vector<8x128xf32>
    %481 = tpu.matmul %480, %7, %cst_158 {dimension_numbers = #tpu.dot_dimension_numbers<[1], [0], [0], [1], [0, 0, 1, 1], [], []>} : vector<8x32xbf16>, vector<32x128xbf16>, vector<8x128xf32> -> vector<8x128xf32>
    %482 = arith.addf %481, %12 : vector<8x128xf32>
    %483 = arith.truncf %440 : vector<8x32xf32> to vector<8x32xbf16>
    %cst_159 = arith.constant dense<0.000000e+00> : vector<8x128xf32>
    %484 = tpu.matmul %483, %9, %cst_159 {dimension_numbers = #tpu.dot_dimension_numbers<[1], [0], [0], [1], [0, 0, 1, 1], [], []>} : vector<8x32xbf16>, vector<32x128xbf16>, vector<8x128xf32> -> vector<8x128xf32>
    %485 = arith.addf %482, %484 : vector<8x128xf32>
    %486 = arith.negf %485 : vector<8x128xf32>
    %487 = math.exp %486 : vector<8x128xf32>
    %cst_160 = arith.constant 1.000000e+00 : f32
    %488 = vector.broadcast %cst_160 : f32 to vector<8x128xf32>
    %489 = arith.addf %488, %487 : vector<8x128xf32>
    %490 = arith.divf %488, %489 : vector<8x128xf32>
    %491 = math.tanh %485 : vector<8x128xf32>
    %492 = vector.extract_strided_slice %490 {offsets = [0, 0], sizes = [8, 32], strides = [1, 1]} : vector<8x128xf32> to vector<8x32xf32>
    %493 = vector.extract_strided_slice %490 {offsets = [0, 32], sizes = [8, 32], strides = [1, 1]} : vector<8x128xf32> to vector<8x32xf32>
    %494 = vector.extract_strided_slice %491 {offsets = [0, 64], sizes = [8, 32], strides = [1, 1]} : vector<8x128xf32> to vector<8x32xf32>
    %495 = vector.extract_strided_slice %490 {offsets = [0, 96], sizes = [8, 32], strides = [1, 1]} : vector<8x128xf32> to vector<8x32xf32>
    %496 = arith.mulf %493, %441 : vector<8x32xf32>
    %497 = arith.mulf %492, %494 : vector<8x32xf32>
    %498 = arith.addf %496, %497 : vector<8x32xf32>
    %499 = math.tanh %498 : vector<8x32xf32>
    %500 = arith.mulf %495, %499 : vector<8x32xf32>
    %501 = arith.select %477, %500, %440 : vector<8x32xf32>
    %502 = arith.select %477, %498, %441 : vector<8x32xf32>
    %503 = arith.extui %477 : i1 to i32
    %c0_i32_161 = arith.constant 0 : i32
    %504 = arith.cmpi ne, %503, %c0_i32_161 : i32
    scf.if %504 {
      %c8_i32_197 = arith.constant 8 : i32
      %582 = arith.muli %479, %c8_i32_197 : i32
      %583 = tpu.assume_multiple %582, 8 : i32
      %584 = arith.index_cast %583 : i32 to index
      %c0_198 = arith.constant 0 : index
      %585 = vector.load %arg12[%584, %c0_198] : memref<64x32xf32, #tpu.memory_space<vmem>>, vector<8x32xf32>
      tpu.vector_store %arg12[%584, %c0_198], %500 {strides = array<i32>} : memref<64x32xf32, #tpu.memory_space<vmem>>, vector<8x32xf32>,
    } else {
    }
    %c8_i32_162 = arith.constant 8 : i32
    %c0_i32_163 = arith.constant 0 : i32
    %505 = arith.subi %c8_i32_162, %c0_i32_163 : i32
    %c0_i32_164 = arith.constant 0 : i32
    %506 = arith.cmpi sge, %505, %c0_i32_164 : i32
    %c8_i32_165 = arith.constant 8 : i32
    %507 = arith.cmpi slt, %505, %c8_i32_165 : i32
    %508 = arith.andi %506, %507 : i1
    %c0_i32_166 = arith.constant 0 : i32
    %c7_i32_167 = arith.constant 7 : i32
    %509 = arith.maxsi %c0_i32_166, %505 : i32
    %510 = arith.minsi %c7_i32_167, %509 : i32
    %c8_i32_168 = arith.constant 8 : i32
    %511 = arith.muli %510, %c8_i32_168 : i32
    %512 = tpu.assume_multiple %511, 8 : i32
    %513 = arith.index_cast %512 : i32 to index
    %c0_169 = arith.constant 0 : index
    %514 = vector.load %arg11[%513, %c0_169] : memref<64x128xf32, #tpu.memory_space<vmem>>, vector<8x128xf32>
    %515 = arith.truncf %472 : vector<8x32xf32> to vector<8x32xbf16>
    %cst_170 = arith.constant dense<0.000000e+00> : vector<8x128xf32>
    %516 = tpu.matmul %515, %8, %cst_170 {dimension_numbers = #tpu.dot_dimension_numbers<[1], [0], [0], [1], [0, 0, 1, 1], [], []>} : vector<8x32xbf16>, vector<32x128xbf16>, vector<8x128xf32> -> vector<8x128xf32>
    %517 = arith.addf %514, %516 : vector<8x128xf32>
    %518 = arith.negf %517 : vector<8x128xf32>
    %519 = math.exp %518 : vector<8x128xf32>
    %cst_171 = arith.constant 1.000000e+00 : f32
    %520 = vector.broadcast %cst_171 : f32 to vector<8x128xf32>
    %521 = arith.addf %520, %519 : vector<8x128xf32>
    %522 = arith.divf %520, %521 : vector<8x128xf32>
    %523 = math.tanh %517 : vector<8x128xf32>
    %524 = vector.extract_strided_slice %522 {offsets = [0, 0], sizes = [8, 32], strides = [1, 1]} : vector<8x128xf32> to vector<8x32xf32>
    %525 = vector.extract_strided_slice %522 {offsets = [0, 32], sizes = [8, 32], strides = [1, 1]} : vector<8x128xf32> to vector<8x32xf32>
    %526 = vector.extract_strided_slice %523 {offsets = [0, 64], sizes = [8, 32], strides = [1, 1]} : vector<8x128xf32> to vector<8x32xf32>
    %527 = vector.extract_strided_slice %522 {offsets = [0, 96], sizes = [8, 32], strides = [1, 1]} : vector<8x128xf32> to vector<8x32xf32>
    %528 = arith.mulf %525, %473 : vector<8x32xf32>
    %529 = arith.mulf %524, %526 : vector<8x32xf32>
    %530 = arith.addf %528, %529 : vector<8x32xf32>
    %531 = math.tanh %530 : vector<8x32xf32>
    %532 = arith.mulf %527, %531 : vector<8x32xf32>
    %533 = arith.select %508, %532, %472 : vector<8x32xf32>
    %534 = arith.select %508, %530, %473 : vector<8x32xf32>
    %c1_i32_172 = arith.constant 1 : i32
    %535 = arith.subi %c8_i32_162, %c1_i32_172 : i32
    %c0_i32_173 = arith.constant 0 : i32
    %536 = arith.cmpi sge, %535, %c0_i32_173 : i32
    %c8_i32_174 = arith.constant 8 : i32
    %537 = arith.cmpi slt, %535, %c8_i32_174 : i32
    %538 = arith.andi %536, %537 : i1
    %c0_i32_175 = arith.constant 0 : i32
    %c7_i32_176 = arith.constant 7 : i32
    %539 = arith.maxsi %c0_i32_175, %535 : i32
    %540 = arith.minsi %c7_i32_176, %539 : i32
    %541 = arith.truncf %472 : vector<8x32xf32> to vector<8x32xbf16>
    %cst_177 = arith.constant dense<0.000000e+00> : vector<8x128xf32>
    %542 = tpu.matmul %541, %7, %cst_177 {dimension_numbers = #tpu.dot_dimension_numbers<[1], [0], [0], [1], [0, 0, 1, 1], [], []>} : vector<8x32xbf16>, vector<32x128xbf16>, vector<8x128xf32> -> vector<8x128xf32>
    %543 = arith.addf %542, %12 : vector<8x128xf32>
    %544 = arith.truncf %501 : vector<8x32xf32> to vector<8x32xbf16>
    %cst_178 = arith.constant dense<0.000000e+00> : vector<8x128xf32>
    %545 = tpu.matmul %544, %9, %cst_178 {dimension_numbers = #tpu.dot_dimension_numbers<[1], [0], [0], [1], [0, 0, 1, 1], [], []>} : vector<8x32xbf16>, vector<32x128xbf16>, vector<8x128xf32> -> vector<8x128xf32>
    %546 = arith.addf %543, %545 : vector<8x128xf32>
    %547 = arith.negf %546 : vector<8x128xf32>
    %548 = math.exp %547 : vector<8x128xf32>
    %cst_179 = arith.constant 1.000000e+00 : f32
    %549 = vector.broadcast %cst_179 : f32 to vector<8x128xf32>
    %550 = arith.addf %549, %548 : vector<8x128xf32>
    %551 = arith.divf %549, %550 : vector<8x128xf32>
    %552 = math.tanh %546 : vector<8x128xf32>
    %553 = vector.extract_strided_slice %551 {offsets = [0, 0], sizes = [8, 32], strides = [1, 1]} : vector<8x128xf32> to vector<8x32xf32>
    %554 = vector.extract_strided_slice %551 {offsets = [0, 32], sizes = [8, 32], strides = [1, 1]} : vector<8x128xf32> to vector<8x32xf32>
    %555 = vector.extract_strided_slice %552 {offsets = [0, 64], sizes = [8, 32], strides = [1, 1]} : vector<8x128xf32> to vector<8x32xf32>
    %556 = vector.extract_strided_slice %551 {offsets = [0, 96], sizes = [8, 32], strides = [1, 1]} : vector<8x128xf32> to vector<8x32xf32>
    %557 = arith.mulf %554, %502 : vector<8x32xf32>
    %558 = arith.mulf %553, %555 : vector<8x32xf32>
    %559 = arith.addf %557, %558 : vector<8x32xf32>
    %560 = math.tanh %559 : vector<8x32xf32>
    %561 = arith.mulf %556, %560 : vector<8x32xf32>
    %562 = arith.select %538, %561, %501 : vector<8x32xf32>
    %563 = arith.select %538, %559, %502 : vector<8x32xf32>
    %564 = arith.extui %538 : i1 to i32
    %c0_i32_180 = arith.constant 0 : i32
    %565 = arith.cmpi ne, %564, %c0_i32_180 : i32
    scf.if %565 {
      %c8_i32_197 = arith.constant 8 : i32
      %582 = arith.muli %540, %c8_i32_197 : i32
      %583 = tpu.assume_multiple %582, 8 : i32
      %584 = arith.index_cast %583 : i32 to index
      %c0_198 = arith.constant 0 : index
      %585 = vector.load %arg12[%584, %c0_198] : memref<64x32xf32, #tpu.memory_space<vmem>>, vector<8x32xf32>
      tpu.vector_store %arg12[%584, %c0_198], %561 {strides = array<i32>} : memref<64x32xf32, #tpu.memory_space<vmem>>, vector<8x32xf32>,
    } else {
    }
    %c9_i32 = arith.constant 9 : i32
    %c0_181 = arith.constant 0 : index
    %c0_182 = arith.constant 0 : index
    %566 = vector.load %arg12[%c0_181, %c0_182] : memref<64x32xf32, #tpu.memory_space<vmem>>, vector<8x32xf32>
    %c8 = arith.constant 8 : index
    %c0_183 = arith.constant 0 : index
    %567 = vector.load %arg12[%c8, %c0_183] : memref<64x32xf32, #tpu.memory_space<vmem>>, vector<8x32xf32>
    %c16 = arith.constant 16 : index
    %c0_184 = arith.constant 0 : index
    %568 = vector.load %arg12[%c16, %c0_184] : memref<64x32xf32, #tpu.memory_space<vmem>>, vector<8x32xf32>
    %c24 = arith.constant 24 : index
    %c0_185 = arith.constant 0 : index
    %569 = vector.load %arg12[%c24, %c0_185] : memref<64x32xf32, #tpu.memory_space<vmem>>, vector<8x32xf32>
    %c32 = arith.constant 32 : index
    %c0_186 = arith.constant 0 : index
    %570 = vector.load %arg12[%c32, %c0_186] : memref<64x32xf32, #tpu.memory_space<vmem>>, vector<8x32xf32>
    %c40 = arith.constant 40 : index
    %c0_187 = arith.constant 0 : index
    %571 = vector.load %arg12[%c40, %c0_187] : memref<64x32xf32, #tpu.memory_space<vmem>>, vector<8x32xf32>
    %c48 = arith.constant 48 : index
    %c0_188 = arith.constant 0 : index
    %572 = vector.load %arg12[%c48, %c0_188] : memref<64x32xf32, #tpu.memory_space<vmem>>, vector<8x32xf32>
    %c56 = arith.constant 56 : index
    %c0_189 = arith.constant 0 : index
    %573 = vector.load %arg12[%c56, %c0_189] : memref<64x32xf32, #tpu.memory_space<vmem>>, vector<8x32xf32>
    %574 = tpu.concatenate %566, %567, %568, %569, %570, %571, %572, %573 in 1 : vector<8x32xf32>, vector<8x32xf32>, vector<8x32xf32>, vector<8x32xf32>, vector<8x32xf32>, vector<8x32xf32>, vector<8x32xf32>, vector<8x32xf32> -> vector<8x256xf32>
    %575 = arith.truncf %574 : vector<8x256xf32> to vector<8x256xbf16>
    %c0_190 = arith.constant 0 : index
    %c0_191 = arith.constant 0 : index
    %576 = vector.load %arg8[%c0_190, %c0_191] : memref<256x128xbf16, #tpu.memory_space<vmem>>, vector<256x128xbf16>
    %cst_192 = arith.constant dense<0.000000e+00> : vector<8x128xf32>
    %577 = tpu.matmul %575, %576, %cst_192 {dimension_numbers = #tpu.dot_dimension_numbers<[1], [0], [0], [1], [0, 0, 1, 1], [], []>} : vector<8x256xbf16>, vector<256x128xbf16>, vector<8x128xf32> -> vector<8x128xf32>
    %c0_193 = arith.constant 0 : index
    %c0_194 = arith.constant 0 : index
    %578 = vector.load %arg9[%c0_193, %c0_194] : memref<1x128xf32, #tpu.memory_space<vmem>>, vector<1x128xf32>
    %579 = vector.broadcast %578 : vector<1x128xf32> to vector<8x128xf32>
    %580 = arith.addf %577, %579 : vector<8x128xf32>
    %c0_195 = arith.constant 0 : index
    %c0_196 = arith.constant 0 : index
    %581 = vector.load %arg10[%c0_195, %c0_196] : memref<8x128xf32, #tpu.memory_space<vmem>>, vector<8x128xf32>
    tpu.vector_store %arg10[%c0_195, %c0_196], %580 {strides = array<i32>} : memref<8x128xf32, #tpu.memory_space<vmem>>, vector<8x128xf32>,
    return
  }
  func.func @transform_0(%arg0: i32) -> (i32, i32) {
    %c0_i32 = arith.constant 0 : i32
    %c0_i32_0 = arith.constant 0 : i32
    return %arg0, %c0_i32 : i32, i32
  }
  func.func @transform_1(%arg0: i32) -> (i32, i32) {
    %c0_i32 = arith.constant 0 : i32
    %c0_i32_0 = arith.constant 0 : i32
    %c0_i32_1 = arith.constant 0 : i32
    return %c0_i32, %c0_i32_0 : i32, i32
  }
  func.func @transform_2(%arg0: i32) -> (i32, i32) {
    %c0_i32 = arith.constant 0 : i32
    %c0_i32_0 = arith.constant 0 : i32
    %c0_i32_1 = arith.constant 0 : i32
    return %c0_i32, %c0_i32_0 : i32, i32
  }
  func.func @transform_3(%arg0: i32) -> (i32, i32) {
    %c0_i32 = arith.constant 0 : i32
    %c0_i32_0 = arith.constant 0 : i32
    %c0_i32_1 = arith.constant 0 : i32
    return %c0_i32, %c0_i32_0 : i32, i32
  }
  func.func @transform_4(%arg0: i32) -> (i32, i32) {
    %c0_i32 = arith.constant 0 : i32
    %c0_i32_0 = arith.constant 0 : i32
    %c0_i32_1 = arith.constant 0 : i32
    return %c0_i32, %c0_i32_0 : i32, i32
  }
  func.func @transform_5(%arg0: i32) -> (i32, i32) {
    %c0_i32 = arith.constant 0 : i32
    %c0_i32_0 = arith.constant 0 : i32
    %c0_i32_1 = arith.constant 0 : i32
    return %c0_i32, %c0_i32_0 : i32, i32
  }
  func.func @transform_6(%arg0: i32) -> (i32, i32) {
    %c0_i32 = arith.constant 0 : i32
    %c0_i32_0 = arith.constant 0 : i32
    %c0_i32_1 = arith.constant 0 : i32
    return %c0_i32, %c0_i32_0 : i32, i32
  }
  func.func @transform_7(%arg0: i32) -> (i32, i32) {
    %c0_i32 = arith.constant 0 : i32
    %c0_i32_0 = arith.constant 0 : i32
    %c0_i32_1 = arith.constant 0 : i32
    return %c0_i32, %c0_i32_0 : i32, i32
  }
  func.func @transform_8(%arg0: i32) -> (i32, i32) {
    %c0_i32 = arith.constant 0 : i32
    %c0_i32_0 = arith.constant 0 : i32
    %c0_i32_1 = arith.constant 0 : i32
    return %c0_i32, %c0_i32_0 : i32, i32
  }
  func.func @transform_9(%arg0: i32) -> (i32, i32) {
    %c0_i32 = arith.constant 0 : i32
    %c0_i32_0 = arith.constant 0 : i32
    return %arg0, %c0_i32 : i32, i32
  }
}

</mosaic_0001>

<bundles_post_ra>
// kernel: lstm_model_pallas.1
= control target key start
LH: loop header
LB: loop body
LE: loop exit
PB: predicated region body
PF: predicated region fallthrough
CT: control target
= control target key end

     0   :  { %vm76_vm0 = vcmask 130048   ;;  %v2561_v1 = vmov 0.0   ;;  %vm2562_vm1 = vmmov 0   ;;  %v2563_v8 = vmov 0   ;;  %s2565_s22 = smov 32   ;;  %s2566_s16 = smov 96   ;;  %s3094_s1 = inlined_call_operand.vmem [shape: bf16[16,128], index: 1, kind: input, shape index: {}]   ;;  %s3095_s0 = inlined_call_operand.vmem [shape: bf16[64,16], index: 0, kind: input, shape index: {}]   ;;  %s3096_s2 = inlined_call_operand.vmem [shape: bf16[32,128], index: 2, kind: input, shape index: {}]   ;;  %s3097_s3 = inlined_call_operand.vmem [shape: f32[1,128], index: 3, kind: input, shape index: {}]   ;;  %s3098_s4 = inlined_call_operand.vmem [shape: bf16[32,128], index: 4, kind: input, shape index: {}]   ;;  %s3099_s5 = inlined_call_operand.vmem [shape: bf16[32,128], index: 5, kind: input, shape index: {}]   ;;  %s3100_s6 = inlined_call_operand.vmem [shape: f32[1,128], index: 6, kind: input, shape index: {}]   ;;  %s3101_s7 = inlined_call_operand.vmem [shape: bf16[256,128], index: 7, kind: input, shape index: {}]   ;;  %s3102_s8 = inlined_call_operand.vmem [shape: f32[1,128], index: 8, kind: input, shape index: {}]   ;;  %s3103_s9 = inlined_call_operand.vmem [shape: f32[8,128], index: 9, kind: output, shape index: {}]  }
   0x1   :  { %v2404_v0 = vld [vmem:[%s3094_s1] sm:$0xff]   ;;  %2167 = vmatprep.subr.bf16.mxu0 %v2561_v1  ;;  %2171 = vmatprep.mubr.msk.bf16.mxu0 %vm2562_vm1, %v2561_v1  ;;  %v2406_v3 = vld [vmem:[%s3095_s0 + $0x8] sm:$0xff]   ;;  %v2408_v5 = vld [vmem:[%s3095_s0 + $0x10] sm:$0xff]   ;;  %vm194_vm2 = vcmask 261120   ;;  %vm1781_vm3 = vcmask 523264   ;;  %vm1783_vm4 = vcmask 785408  }
   0x2   :  { %v2405_v2 = vld [vmem:[%s3095_s0] sm:$0xff]   ;;  %2141 = vmatprep.subr.bf16.mxu1 %v2404_v0  ;;  %v2645_v6 = vld [vmem:[%s3096_s2 + $0x8] sm:$0xff]   ;;  %v2409_v7 = vld [vmem:[%s3095_s0 + $0x18] sm:$0xff]  }
   0x3   :  { %2142 = vmatpush3.bf16.msra.mxu1 %v2404_v0  ;;  %2143 = vmatprep.mubr.msk.bf16.mxu1 %vm76_vm0, %v2405_v2  ;;  %v2633_v4 = vld [vmem:[%s3096_s2] sm:$0xff]   ;;  %v2694_v42 = vld [vmem:[%s3098_s4 + $0x8] sm:$0xff]  }
   0x4   :  { %2151 = vmatprep.subr.bf16.mxu1 %v2561_v1  ;;  %v1970_v9 = vld [vmem:[%s3097_s3] ss:$0 sm:$0xff]  ;;  %s2564_s3 = smov 64   ;;  %v2712_v49 = vld [vmem:[%s3099_s5 + $0x8] sm:$0xff]  }
   0x5   :  { %v2688_v41 = vld [vmem:[%s3098_s4] sm:$0xff]  }
   0x6   :  { %2144 = vmatmul.mubr.msk.bf16.vlgmr.msra.gmra.mrb[0].mxu1 %vm76_vm0, %v2406_v3  ;;  %2168 = vmatpush3.bf16.msra.mxu0 %v2688_v41  ;;  %v2704_v47 = vld [vmem:[%s3099_s5] sm:$0xff]  }
   0x7   :  { %2152 = vmatpush3.bf16.msra.mxu1 %v2633_v4  ;;  %2147 = vmatprep.mubr.msk.bf16.mxu1 %vm76_vm0, %v2408_v5  ;;  %v2736_v55 = vld [vmem:[%s3100_s6] ss:$0 sm:$0xff] }
   0x8   :  { %2153 = vmatprep.subr.bf16.mxu1 %v2561_v1  ;;  %2169 = vmatprep.subr.bf16.mxu0 %v2561_v1 }
   0xa   :  { %2170 = vmatpush3.bf16.msra.mxu0 %v2694_v42 }
   0xb   :  { %2154 = vmatpush3.bf16.msra.mxu1 %v2645_v6  ;;  %2175 = vmatprep.subr.bf16.mxu0 %v2561_v1 }
   0xc   :  { %2159 = vmatprep.subr.bf16.mxu1 %v2561_v1 }
   0xe   :  { %2148 = vmatmul.mubr.msk.bf16.gmra.mrb[4].mxu1 %vm76_vm0, %v2409_v7 }
   0xf   :  { %2155 = vmatprep.mubr.msk.bf16.mxu1 %vm2562_vm1, %v2561_v1 }
  0x16   :  { %2156 = vmatmul.mubr.bf16.vlgmr.msra.gmra.mrb[8].mxu1 %v2563_v8 }
  0x17   :  { %2160 = vmatpush3.bf16.msra.mxu1 %v2633_v4  ;;  %2163 = vmatprep.mubr.msk.bf16.mxu1 %vm2562_vm1, %v2561_v1 }
  0x18   :  { %2161 = vmatprep.subr.bf16.mxu1 %v2561_v1 }
  0x1b   :  { %2162 = vmatpush3.bf16.msra.mxu1 %v2645_v6 }
  0x1c   :  { %2183 = vmatprep.subr.bf16.mxu1 %v2561_v1 }
  0xd9   :  { %v2145_v10 = vpop.f32.mrb[0].mxu1 }
  0xda   :  { %v2666_v11 = vadd.f32 %v2145_v10, %v1970_v9  ;;  %v123_v12 = vpop.f32.mrb[1].mxu1 }
  0xdb   :  { %v2146_v13 = vpop.f32.mrb[2].mxu1  ;;  %v124_v25 = vadd.f32 %v1970_v9, %v123_v12 }
  0xdc   :  { %v2668_v14 = vadd.f32 %v2146_v13, %v1970_v9  ;;  %v126_v15 = vpop.f32.mrb[3].mxu1 }
  0xdd   :  { %v2670_v16 = vadd.f32 %v1970_v9, %v126_v15 }
  0xe1   :  { %v2149_v17 = vpop.f32.mrb[4].mxu1 }
  0xe2   :  { %v2672_v18 = vadd.f32 %v2149_v17, %v1970_v9  ;;  %v139_v19 = vpop.f32.mrb[5].mxu1 }
  0xe3   :  { %v2674_v20 = vadd.f32 %v1970_v9, %v139_v19  ;;  %v2150_v21 = vpop.f32.mrb[6].mxu1 }
  0xe4   :  { %v2676_v22 = vadd.f32 %v2150_v21, %v1970_v9  ;;  %v142_v23 = vpop.f32.mrb[7].mxu1 }
  0xe5   :  { %v2678_v24 = vadd.f32 %v1970_v9, %v142_v23 }
  0xe9   :  { %v232_v26 = vpop.f32.mrb[8].mxu1 }
  0xea   :  { %v238_v27 = vadd.f32 %v232_v26, %v124_v25  ;;  %v2157_v28 = vpop.f32.mrb[9].mxu1 }
  0xeb   :  { %v235_v29 = vpop.f32.mrb[10].mxu1 }
  0xec   :  { %2431 = vtanh.f32 %v238_v27  ;;  %v2158_v30 = vpop.f32.mrb[11].mxu1  ;;  %v1983_v32 = vmul.f32 -1.442695, %v238_v27 }
  0xee   :  { %2433 = vpow2.f32 %v1983_v32 }
  0xf6   :  { %v2432_v31 = vpop.eup %2431 }
  0xf7   :  { %248 = vrot.lane.b32.xlu0 %v2432_v31, %s2564_s3 }
  0xf8   :  { %v2434_v33 = vpop.eup %2433 }
  0xf9   :  { %v242_v34 = vadd.f32 1.0, %v2434_v33 }
  0xfb   :  { %2435 = vrcp.f32 %v242_v34 }
 0x105   :  { %v2436_v35 = vpop.eup %2435 }
 0x106   :  { %v246_v38 = vmul.f32 0.0, %v2436_v35 }
 0x169   :  { %v249_v36 = vpop.permute.xlu0 %248 }
 0x16a   :  { %v251_v37 = vmul.f32 %v2436_v35, %v249_v36 }
 0x16c   :  { %253 = vrot.lane.b32.xlu0 %v251_v37, %s2565_s22 }
 0x1de   :  { %v254_v39 = vpop.permute.xlu0 %253 }
 0x1df   :  { %v2682_v40 = vadd.f32 %v254_v39, %v246_v38 }
 0x1e1   :  { %2437 = vtanh.f32 %v2682_v40 }
 0x1eb   :  { %v2438_v43 = vpop.eup %2437 }
 0x1ec   :  { %259 = vrot.lane.b32.xlu1 %v2438_v43, %s2564_s3 }
 0x25e   :  { %v260_v44 = vpop.permute.xlu1 %259 }
 0x25f   :  { %v262_v45 = vmul.f32 %v2436_v35, %v260_v44 }
 0x261   :  { %v265_v46 = vpack.c.bf16 %v262_v45, %v262_v45 }
 0x263   :  { %267 = vrot.lane.b32.xlu1 %v265_v46, %s2565_s22 }
 0x2d5   :  { %v268_v48 = vpop.permute.xlu1 %267 }
 0x2d6   :  { %2164 = vmatmul.mubr.msk.bf16.vlgmr.msra.gmra.mrb[12].mxu1 %vm194_vm2, %v268_v48  ;;  %2172 = vmatmul.mubr.msk.bf16.vlgmr.msra.gmra.mrb[0].mxu0 %vm194_vm2, %v268_v48 }
 0x2d7   :  { %2176 = vmatpush3.bf16.msra.mxu0 %v2704_v47  ;;  %2179 = vmatprep.mubr.msk.bf16.mxu0 %vm2562_vm1, %v2561_v1 }
 0x2d8   :  { %2177 = vmatprep.subr.bf16.mxu0 %v2561_v1  ;;  %2184 = vmatpush3.bf16.msra.mxu1 %v2633_v4 }
 0x2d9   :  { %2185 = vmatprep.subr.bf16.mxu1 %v2561_v1  ;;  %2187 = vmatprep.mubr.msk.bf16.mxu1 %vm2562_vm1, %v2561_v1 }
 0x2db   :  { %2178 = vmatpush3.bf16.msra.mxu0 %v2712_v49 }
 0x2dc   :  { %2186 = vmatpush3.bf16.msra.mxu1 %v2645_v6  ;;  %2207 = vmatprep.subr.bf16.mxu0 %v2561_v1 }
 0x2dd   :  { %2191 = vmatprep.subr.bf16.mxu1 %v2561_v1 }
 0x2e2   :  { %2180 = vmatmul.mubr.bf16.vlgmr.msra.gmra.mrb[0].mxu0 %v2563_v8 }
 0x2e3   :  { %2208 = vmatpush3.bf16.msra.mxu0 %v2633_v4  ;;  %2211 = vmatprep.mubr.msk.bf16.mxu0 %vm2562_vm1, %v2561_v1 }
 0x2e4   :  { %2209 = vmatprep.subr.bf16.mxu0 %v2561_v1 }
 0x2e7   :  { %2210 = vmatpush3.bf16.msra.mxu0 %v2645_v6 }
 0x2e8   :  { %2215 = vmatprep.subr.bf16.mxu0 %v2561_v1 }
 0x3a9   :  { %v306_v50 = vpop.f32.mrb[12].mxu1 }
 0x3aa   :  { %v312_v51 = vadd.f32 %v306_v50, %v2670_v16  ;;  %v2165_v52 = vpop.f32.mrb[13].mxu1 }
 0x3ab   :  { %v309_v53 = vpop.f32.mrb[14].mxu1 }
 0x3ac   :  { %2439 = vtanh.f32 %v312_v51  ;;  %v2166_v54 = vpop.f32.mrb[15].mxu1  ;;  %v1985_v63 = vmul.f32 -1.442695, %v312_v51 }
 0x3b5   :  { %v435_v56 = vpop.f32.mrb[0].mxu0 }
 0x3b6   :  { %v2440_v57 = vpop.eup %2439  ;;  %v2343_v58 = vadd.f32 %v2736_v55, %v435_v56  ;;  %v2181_v59 = vpop.f32.mrb[1].mxu0 }
 0x3b7   :  { %v438_v60 = vpop.f32.mrb[2].mxu0  ;;  %322 = vrot.lane.b32.xlu0 %v2440_v57, %s2564_s3 }
 0x3b8   :  { %2441 = vtanh.f32 %v2343_v58  ;;  %v2182_v61 = vpop.f32.mrb[3].mxu0  ;;  %v1991_v0 = vmul.f32 -1.442695, %v2343_v58 }
 0x3b9   :  { %2443 = vpow2.f32 %v1985_v63 }
 0x3ba   :  { %2445 = vpow2.f32 %v1991_v0 }
 0x3c2   :  { %v2442_v62 = vpop.eup %2441 }
 0x3c3   :  { %451 = vrot.lane.b32.xlu1 %v2442_v62, %s2564_s3  ;;  %v2444_v2 = vpop.eup %2443 }
 0x3c4   :  { %v316_v3 = vadd.f32 1.0, %v2444_v2  ;;  %v2446_v5 = vpop.eup %2445 }
 0x3c5   :  { %v445_v7 = vadd.f32 1.0, %v2446_v5 }
 0x3c6   :  { %2447 = vrcp.f32 %v316_v3 }
 0x3c7   :  { %2449 = vrcp.f32 %v445_v7 }
 0x3d0   :  { %v2448_v8 = vpop.eup %2447 }
 0x3d1   :  { %v2450_v12 = vpop.eup %2449  ;;  %v320_v16 = vmul.f32 %v2448_v8, %v2682_v40 }
 0x3d2   :  { %v449_v21 = vmul.f32 0.0, %v2450_v12 }
 0x429   :  { %v323_v9 = vpop.permute.xlu0 %322 }
 0x42a   :  { %v325_v10 = vmul.f32 %v2448_v8, %v323_v9 }
 0x42c   :  { %327 = vrot.lane.b32.xlu0 %v325_v10, %s2565_s22 }
 0x435   :  { %v452_v13 = vpop.permute.xlu1 %451 }
 0x436   :  { %v454_v15 = vmul.f32 %v2450_v12, %v452_v13 }
 0x438   :  { %456 = vrot.lane.b32.xlu1 %v454_v15, %s2565_s22 }
 0x49e   :  { %v328_v17 = vpop.permute.xlu0 %327 }
 0x49f   :  { %v2744_v19 = vadd.f32 %v328_v17, %v320_v16 }
 0x4a1   :  { %2451 = vtanh.f32 %v2744_v19 }
 0x4aa   :  { %v457_v23 = vpop.permute.xlu1 %456 }
 0x4ab   :  { %v2452_v25 = vpop.eup %2451  ;;  %v2747_v26 = vadd.f32 %v457_v23, %v449_v21 }
 0x4ac   :  { %333 = vrot.lane.b32.xlu0 %v2452_v25, %s2564_s3 }
 0x4ad   :  { %2453 = vtanh.f32 %v2747_v26 }
 0x4b7   :  { %v2454_v27 = vpop.eup %2453 }
 0x4b8   :  { %462 = vrot.lane.b32.xlu1 %v2454_v27, %s2564_s3 }
 0x51e   :  { %v334_v28 = vpop.permute.xlu0 %333 }
 0x51f   :  { %v336_v29 = vmul.f32 %v2448_v8, %v334_v28 }
 0x521   :  { %v473_v30 = vpack.c.bf16 %v336_v29, %v336_v29 }
 0x523   :  { %475 = vrot.lane.b32.xlu0 %v473_v30, %s2565_s22 }
 0x52a   :  { %v463_v31 = vpop.permute.xlu1 %462 }
 0x52b   :  { %v2753_v32 = vmul.f32 %v2450_v12, %v463_v31 }
 0x52d   :  { %v585_v33 = vpack.c.bf16 %v2753_v32, %v2753_v32 }
 0x52f   :  { %587 = vrot.lane.b32.xlu1 %v585_v33, %s2565_s22 }
 0x595   :  { %v476_v34 = vpop.permute.xlu0 %475 }
 0x596   :  { %2188 = vmatmul.mubr.msk.bf16.vlgmr.msra.gmra.mrb[16].mxu1 %vm194_vm2, %v476_v34 }
 0x597   :  { %2192 = vmatpush3.bf16.msra.mxu1 %v2688_v41  ;;  %2195 = vmatprep.mubr.msk.bf16.mxu1 %vm2562_vm1, %v2561_v1 }
 0x598   :  { %2193 = vmatprep.subr.bf16.mxu1 %v2561_v1 }
 0x59b   :  { %2194 = vmatpush3.bf16.msra.mxu1 %v2694_v42 }
 0x59c   :  { %2199 = vmatprep.subr.bf16.mxu1 %v2561_v1 }
 0x59e   :  { %2196 = vmatmul.mubr.msk.bf16.vlgmr.msra.gmra.mrb[20].mxu1 %vm194_vm2, %v476_v34 }
 0x59f   :  { %2200 = vmatpush3.bf16.msra.mxu1 %v2704_v47  ;;  %2203 = vmatprep.mubr.msk.bf16.mxu1 %vm2562_vm1, %v2561_v1 }
 0x5a0   :  { %2201 = vmatprep.subr.bf16.mxu1 %v2561_v1 }
 0x5a1   :  { %v588_v35 = vpop.permute.xlu1 %587 }
 0x5a3   :  { %2202 = vmatpush3.bf16.msra.mxu1 %v2712_v49 }
 0x5a4   :  { %2231 = vmatprep.subr.bf16.mxu1 %v2561_v1 }
 0x5aa   :  { %2204 = vmatmul.mubr.msk.bf16.vlgmr.msra.gmra.mrb[20].mxu1 %vm194_vm2, %v588_v35 }
 0x5ab   :  { %2232 = vmatpush3.bf16.msra.mxu1 %v2633_v4  ;;  %2235 = vmatprep.mubr.msk.bf16.mxu1 %vm2562_vm1, %v2561_v1 }
 0x5ac   :  { %2233 = vmatprep.subr.bf16.mxu1 %v2561_v1 }
 0x5af   :  { %2234 = vmatpush3.bf16.msra.mxu1 %v2645_v6 }
 0x5b0   :  { %2239 = vmatprep.subr.bf16.mxu1 %v2561_v1 }
 0x669   :  { %v514_v36 = vpop.f32.mrb[16].mxu1 }
 0x66a   :  { %v520_v37 = vadd.f32 %v514_v36, %v2666_v11  ;;  %v2189_v38 = vpop.f32.mrb[17].mxu1 }
 0x66b   :  { %v517_v39 = vpop.f32.mrb[18].mxu1 }
 0x66c   :  { %2455 = vtanh.f32 %v520_v37  ;;  %v2190_v40 = vpop.f32.mrb[19].mxu1  ;;  %v1993_v52 = vmul.f32 -1.442695, %v520_v37 }
 0x676   :  { %v2456_v43 = vpop.eup %2455 }
 0x677   :  { %530 = vrot.lane.b32.xlu0 %v2456_v43, %s2564_s3 }
 0x67d   :  { %v626_v44 = vpop.f32.mrb[20].mxu1 }
 0x67e   :  { %v2344_v45 = vadd.f32 %v2736_v55, %v626_v44  ;;  %v2205_v46 = vpop.f32.mrb[21].mxu1 }
 0x67f   :  { %v629_v48 = vpop.f32.mrb[22].mxu1 }
 0x680   :  { %2457 = vtanh.f32 %v2344_v45  ;;  %v2206_v50 = vpop.f32.mrb[23].mxu1  ;;  %v1996_v54 = vmul.f32 -1.442695, %v2344_v45 }
 0x681   :  { %2459 = vpow2.f32 %v1993_v52 }
 0x68a   :  { %v2458_v51 = vpop.eup %2457 }
 0x68b   :  { %642 = vrot.lane.b32.xlu1 %v2458_v51, %s2564_s3  ;;  %v2460_v11 = vpop.eup %2459 }
 0x68c   :  { %v524_v53 = vadd.f32 1.0, %v2460_v11 }
 0x68e   :  { %2461 = vrcp.f32 %v524_v53 }
 0x68f   :  { %2463 = vpow2.f32 %v1996_v54 }
 0x698   :  { %v2462_v56 = vpop.eup %2461 }
 0x699   :  { %v2464_v59 = vpop.eup %2463  ;;  %v528_v0 = vmul.f32 %v2462_v56, %v2744_v19 }
 0x69a   :  { %v636_v60 = vadd.f32 1.0, %v2464_v59 }
 0x69c   :  { %2465 = vrcp.f32 %v636_v60 }
 0x6a6   :  { %v2466_v61 = vpop.eup %2465 }
 0x6a7   :  { %v640_v7 = vmul.f32 %v2466_v61, %v2747_v26 }
 0x6e9   :  { %v531_v57 = vpop.permute.xlu0 %530 }
 0x6ea   :  { %v533_v58 = vmul.f32 %v2462_v56, %v531_v57 }
 0x6ec   :  { %535 = vrot.lane.b32.xlu0 %v533_v58, %s2565_s22 }
 0x6fd   :  { %v643_v62 = vpop.permute.xlu1 %642 }
 0x6fe   :  { %v645_v63 = vmul.f32 %v2466_v61, %v643_v62 }
 0x700   :  { %647 = vrot.lane.b32.xlu1 %v645_v63, %s2565_s22 }
 0x75e   :  { %v536_v2 = vpop.permute.xlu0 %535 }
 0x75f   :  { %v2786_v3 = vadd.f32 %v536_v2, %v528_v0 }
 0x761   :  { %2467 = vtanh.f32 %v2786_v3 }
 0x76b   :  { %v2468_v5 = vpop.eup %2467 }
 0x76c   :  { %541 = vrot.lane.b32.xlu0 %v2468_v5, %s2564_s3 }
 0x772   :  { %v648_v8 = vpop.permute.xlu1 %647 }
 0x773   :  { %v2791_v9 = vadd.f32 %v648_v8, %v640_v7 }
 0x775   :  { %2469 = vtanh.f32 %v2791_v9 }
 0x77f   :  { %v2470_v10 = vpop.eup %2469 }
 0x780   :  { %653 = vrot.lane.b32.xlu1 %v2470_v10, %s2564_s3 }
 0x7de   :  { %v542_v12 = vpop.permute.xlu0 %541 }
 0x7df   :  { %v544_v13 = vmul.f32 %v2462_v56, %v542_v12 }
 0x7e1   :  { %v665_v15 = vpack.c.bf16 %v544_v13, %v544_v13 }
 0x7e3   :  { %667 = vrot.lane.b32.xlu0 %v665_v15, %s2565_s22 }
 0x7f2   :  { %v654_v16 = vpop.permute.xlu1 %653 }
 0x7f3   :  { %v2796_v17 = vmul.f32 %v2466_v61, %v654_v16 }
 0x7f5   :  { %v777_v19 = vpack.c.bf16 %v2796_v17, %v2796_v17 }
 0x7f7   :  { %779 = vrot.lane.b32.xlu1 %v777_v19, %s2565_s22 }
 0x855   :  { %v668_v21 = vpop.permute.xlu0 %667 }
 0x856   :  { %2212 = vmatmul.mubr.msk.bf16.vlgmr.msra.gmra.mrb[4].mxu0 %vm194_vm2, %v668_v21 }
 0x857   :  { %2216 = vmatpush3.bf16.msra.mxu0 %v2688_v41  ;;  %2219 = vmatprep.mubr.msk.bf16.mxu0 %vm2562_vm1, %v2561_v1 }
 0x858   :  { %2217 = vmatprep.subr.bf16.mxu0 %v2561_v1 }
 0x85b   :  { %2218 = vmatpush3.bf16.msra.mxu0 %v2694_v42 }
 0x85c   :  { %2223 = vmatprep.subr.bf16.mxu0 %v2561_v1 }
 0x85e   :  { %2220 = vmatmul.mubr.msk.bf16.vlgmr.msra.gmra.mrb[8].mxu0 %vm194_vm2, %v668_v21 }
 0x85f   :  { %2224 = vmatpush3.bf16.msra.mxu0 %v2704_v47  ;;  %2227 = vmatprep.mubr.msk.bf16.mxu0 %vm2562_vm1, %v2561_v1 }
 0x860   :  { %2225 = vmatprep.subr.bf16.mxu0 %v2561_v1 }
 0x863   :  { %2226 = vmatpush3.bf16.msra.mxu0 %v2712_v49 }
 0x864   :  { %2255 = vmatprep.subr.bf16.mxu0 %v2561_v1 }
 0x869   :  { %v780_v23 = vpop.permute.xlu1 %779 }
 0x86a   :  { %2228 = vmatmul.mubr.msk.bf16.vlgmr.msra.gmra.mrb[8].mxu0 %vm194_vm2, %v780_v23 }
 0x86b   :  { %2256 = vmatpush3.bf16.msra.mxu0 %v2633_v4  ;;  %2259 = vmatprep.mubr.msk.bf16.mxu0 %vm2562_vm1, %v2561_v1 }
 0x86c   :  { %2257 = vmatprep.subr.bf16.mxu0 %v2561_v1 }
 0x86f   :  { %2258 = vmatpush3.bf16.msra.mxu0 %v2645_v6 }
 0x870   :  { %2263 = vmatprep.subr.bf16.mxu0 %v2561_v1 }
 0x929   :  { %v706_v25 = vpop.f32.mrb[4].mxu0 }
 0x92a   :  { %v712_v26 = vadd.f32 %v706_v25, %v2668_v14  ;;  %v2213_v27 = vpop.f32.mrb[5].mxu0 }
 0x92b   :  { %v709_v28 = vpop.f32.mrb[6].mxu0 }
 0x92c   :  { %2471 = vtanh.f32 %v712_v26  ;;  %v2214_v29 = vpop.f32.mrb[7].mxu0  ;;  %v1998_v38 = vmul.f32 -1.442695, %v712_v26 }
 0x936   :  { %v2472_v30 = vpop.eup %2471 }
 0x937   :  { %722 = vrot.lane.b32.xlu0 %v2472_v30, %s2564_s3 }
 0x93d   :  { %v818_v31 = vpop.f32.mrb[8].mxu0 }
 0x93e   :  { %v2345_v33 = vadd.f32 %v2736_v55, %v818_v31  ;;  %v2229_v34 = vpop.f32.mrb[9].mxu0 }
 0x93f   :  { %v821_v35 = vpop.f32.mrb[10].mxu0 }
 0x940   :  { %2473 = vtanh.f32 %v2345_v33  ;;  %v2230_v36 = vpop.f32.mrb[11].mxu0  ;;  %v2001_v40 = vmul.f32 -1.442695, %v2345_v33 }
 0x941   :  { %2475 = vpow2.f32 %v1998_v38 }
 0x94a   :  { %v2474_v37 = vpop.eup %2473 }
 0x94b   :  { %834 = vrot.lane.b32.xlu1 %v2474_v37, %s2564_s3  ;;  %v2476_v14 = vpop.eup %2475 }
 0x94c   :  { %v716_v39 = vadd.f32 1.0, %v2476_v14 }
 0x94e   :  { %2477 = vrcp.f32 %v716_v39 }
 0x94f   :  { %2479 = vpow2.f32 %v2001_v40 }
 0x958   :  { %v2478_v43 = vpop.eup %2477 }
 0x959   :  { %v2480_v46 = vpop.eup %2479  ;;  %v720_v11 = vmul.f32 %v2478_v43, %v2786_v3 }
 0x95a   :  { %v828_v48 = vadd.f32 1.0, %v2480_v46 }
 0x95c   :  { %2481 = vrcp.f32 %v828_v48 }
 0x966   :  { %v2482_v50 = vpop.eup %2481 }
 0x967   :  { %v832_v57 = vmul.f32 %v2482_v50, %v2791_v9 }
 0x9a9   :  { %v723_v44 = vpop.permute.xlu0 %722 }
 0x9aa   :  { %v725_v45 = vmul.f32 %v2478_v43, %v723_v44 }
 0x9ac   :  { %727 = vrot.lane.b32.xlu0 %v725_v45, %s2565_s22 }
 0x9bd   :  { %v835_v51 = vpop.permute.xlu1 %834 }
 0x9be   :  { %v837_v52 = vmul.f32 %v2482_v50, %v835_v51 }
 0x9c0   :  { %839 = vrot.lane.b32.xlu1 %v837_v52, %s2565_s22 }
 0xa1e   :  { %v728_v53 = vpop.permute.xlu0 %727 }
 0xa1f   :  { %v2829_v54 = vadd.f32 %v728_v53, %v720_v11 }
 0xa21   :  { %2483 = vtanh.f32 %v2829_v54 }
 0xa2b   :  { %v2484_v56 = vpop.eup %2483 }
 0xa2c   :  { %733 = vrot.lane.b32.xlu0 %v2484_v56, %s2564_s3 }
 0xa32   :  { %v840_v58 = vpop.permute.xlu1 %839 }
 0xa33   :  { %v2834_v59 = vadd.f32 %v840_v58, %v832_v57 }
 0xa35   :  { %2485 = vtanh.f32 %v2834_v59 }
 0xa3f   :  { %v2486_v60 = vpop.eup %2485 }
 0xa40   :  { %845 = vrot.lane.b32.xlu1 %v2486_v60, %s2564_s3 }
 0xa9e   :  { %v734_v61 = vpop.permute.xlu0 %733 }
 0xa9f   :  { %v736_v62 = vmul.f32 %v2478_v43, %v734_v61 }
 0xaa1   :  { %v857_v63 = vpack.c.bf16 %v736_v62, %v736_v62 }
 0xaa3   :  { %859 = vrot.lane.b32.xlu0 %v857_v63, %s2565_s22 }
 0xab2   :  { %v846_v0 = vpop.permute.xlu1 %845 }
 0xab3   :  { %v2839_v2 = vmul.f32 %v2482_v50, %v846_v0 }
 0xab5   :  { %v969_v3 = vpack.c.bf16 %v2839_v2, %v2839_v2 }
 0xab7   :  { %971 = vrot.lane.b32.xlu1 %v969_v3, %s2565_s22 }
 0xb15   :  { %v860_v5 = vpop.permute.xlu0 %859 }
 0xb16   :  { %2236 = vmatmul.mubr.msk.bf16.vlgmr.msra.gmra.mrb[24].mxu1 %vm194_vm2, %v860_v5 }
 0xb17   :  { %2240 = vmatpush3.bf16.msra.mxu1 %v2688_v41  ;;  %2243 = vmatprep.mubr.msk.bf16.mxu1 %vm2562_vm1, %v2561_v1 }
 0xb18   :  { %2241 = vmatprep.subr.bf16.mxu1 %v2561_v1 }
 0xb1b   :  { %2242 = vmatpush3.bf16.msra.mxu1 %v2694_v42 }
 0xb1c   :  { %2247 = vmatprep.subr.bf16.mxu1 %v2561_v1 }
 0xb1e   :  { %2244 = vmatmul.mubr.msk.bf16.vlgmr.msra.gmra.mrb[28].mxu1 %vm194_vm2, %v860_v5 }
 0xb1f   :  { %2248 = vmatpush3.bf16.msra.mxu1 %v2704_v47  ;;  %2251 = vmatprep.mubr.msk.bf16.mxu1 %vm2562_vm1, %v2561_v1 }
 0xb20   :  { %2249 = vmatprep.subr.bf16.mxu1 %v2561_v1 }
 0xb23   :  { %2250 = vmatpush3.bf16.msra.mxu1 %v2712_v49 }
 0xb24   :  { %2279 = vmatprep.subr.bf16.mxu1 %v2561_v1 }
 0xb29   :  { %v972_v7 = vpop.permute.xlu1 %971 }
 0xb2a   :  { %2252 = vmatmul.mubr.msk.bf16.vlgmr.msra.gmra.mrb[28].mxu1 %vm194_vm2, %v972_v7 }
 0xb2b   :  { %2280 = vmatpush3.bf16.msra.mxu1 %v2633_v4  ;;  %2283 = vmatprep.mubr.msk.bf16.mxu1 %vm2562_vm1, %v2561_v1 }
 0xb2c   :  { %2281 = vmatprep.subr.bf16.mxu1 %v2561_v1 }
 0xb2f   :  { %2282 = vmatpush3.bf16.msra.mxu1 %v2645_v6 }
 0xb30   :  { %2287 = vmatprep.subr.bf16.mxu1 %v2561_v1 }
 0xbe9   :  { %v898_v8 = vpop.f32.mrb[24].mxu1 }
 0xbea   :  { %v904_v9 = vadd.f32 %v898_v8, %v2674_v20  ;;  %v2237_v10 = vpop.f32.mrb[25].mxu1 }
 0xbeb   :  { %v901_v12 = vpop.f32.mrb[26].mxu1 }
 0xbec   :  { %2487 = vtanh.f32 %v904_v9  ;;  %v2238_v13 = vpop.f32.mrb[27].mxu1  ;;  %v2003_v27 = vmul.f32 -1.442695, %v904_v9 }
 0xbf6   :  { %v2488_v15 = vpop.eup %2487 }
 0xbf7   :  { %914 = vrot.lane.b32.xlu0 %v2488_v15, %s2564_s3 }
 0xbfd   :  { %v1010_v16 = vpop.f32.mrb[28].mxu1 }
 0xbfe   :  { %v2346_v19 = vadd.f32 %v2736_v55, %v1010_v16  ;;  %v2253_v21 = vpop.f32.mrb[29].mxu1 }
 0xbff   :  { %v1013_v23 = vpop.f32.mrb[30].mxu1 }
 0xc00   :  { %2489 = vtanh.f32 %v2346_v19  ;;  %v2254_v25 = vpop.f32.mrb[31].mxu1  ;;  %v2006_v29 = vmul.f32 -1.442695, %v2346_v19 }
 0xc01   :  { %2491 = vpow2.f32 %v2003_v27 }
 0xc0a   :  { %v2490_v26 = vpop.eup %2489 }
 0xc0b   :  { %1026 = vrot.lane.b32.xlu1 %v2490_v26, %s2564_s3  ;;  %v2492_v20 = vpop.eup %2491 }
 0xc0c   :  { %v908_v28 = vadd.f32 1.0, %v2492_v20 }
 0xc0e   :  { %2493 = vrcp.f32 %v908_v28 }
 0xc0f   :  { %2495 = vpow2.f32 %v2006_v29 }
 0xc18   :  { %v2494_v30 = vpop.eup %2493 }
 0xc19   :  { %v2496_v34 = vpop.eup %2495  ;;  %v912_v14 = vmul.f32 %v2494_v30, %v2829_v54 }
 0xc1a   :  { %v1020_v35 = vadd.f32 1.0, %v2496_v34 }
 0xc1c   :  { %2497 = vrcp.f32 %v1020_v35 }
 0xc26   :  { %v2498_v36 = vpop.eup %2497 }
 0xc27   :  { %v1024_v44 = vmul.f32 %v2498_v36, %v2834_v59 }
 0xc69   :  { %v915_v31 = vpop.permute.xlu0 %914 }
 0xc6a   :  { %v917_v33 = vmul.f32 %v2494_v30, %v915_v31 }
 0xc6c   :  { %919 = vrot.lane.b32.xlu0 %v917_v33, %s2565_s22 }
 0xc7d   :  { %v1027_v37 = vpop.permute.xlu1 %1026 }
 0xc7e   :  { %v1029_v38 = vmul.f32 %v2498_v36, %v1027_v37 }
 0xc80   :  { %1031 = vrot.lane.b32.xlu1 %v1029_v38, %s2565_s22 }
 0xcde   :  { %v920_v39 = vpop.permute.xlu0 %919 }
 0xcdf   :  { %v2872_v40 = vadd.f32 %v920_v39, %v912_v14 }
 0xce1   :  { %2499 = vtanh.f32 %v2872_v40 }
 0xceb   :  { %v2500_v43 = vpop.eup %2499 }
 0xcec   :  { %925 = vrot.lane.b32.xlu0 %v2500_v43, %s2564_s3 }
 0xcf2   :  { %v1032_v45 = vpop.permute.xlu1 %1031 }
 0xcf3   :  { %v2877_v46 = vadd.f32 %v1032_v45, %v1024_v44 }
 0xcf5   :  { %2501 = vtanh.f32 %v2877_v46 }
 0xcff   :  { %v2502_v48 = vpop.eup %2501 }
 0xd00   :  { %1037 = vrot.lane.b32.xlu1 %v2502_v48, %s2564_s3 }
 0xd5e   :  { %v926_v50 = vpop.permute.xlu0 %925 }
 0xd5f   :  { %v928_v51 = vmul.f32 %v2494_v30, %v926_v50 }
 0xd61   :  { %v1049_v52 = vpack.c.bf16 %v928_v51, %v928_v51 }
 0xd63   :  { %1051 = vrot.lane.b32.xlu0 %v1049_v52, %s2565_s22 }
 0xd72   :  { %v1038_v11 = vpop.permute.xlu1 %1037 }
 0xd73   :  { %v2882_v53 = vmul.f32 %v2498_v36, %v1038_v11 }
 0xd75   :  { %v1161_v54 = vpack.c.bf16 %v2882_v53, %v2882_v53 }
 0xd77   :  { %1163 = vrot.lane.b32.xlu1 %v1161_v54, %s2565_s22 }
 0xdd5   :  { %v1052_v56 = vpop.permute.xlu0 %1051 }
 0xdd6   :  { %2260 = vmatmul.mubr.msk.bf16.vlgmr.msra.gmra.mrb[12].mxu0 %vm194_vm2, %v1052_v56 }
 0xdd7   :  { %2264 = vmatpush3.bf16.msra.mxu0 %v2688_v41  ;;  %2267 = vmatprep.mubr.msk.bf16.mxu0 %vm2562_vm1, %v2561_v1 }
 0xdd8   :  { %2265 = vmatprep.subr.bf16.mxu0 %v2561_v1 }
 0xddb   :  { %2266 = vmatpush3.bf16.msra.mxu0 %v2694_v42 }
 0xddc   :  { %2271 = vmatprep.subr.bf16.mxu0 %v2561_v1 }
 0xdde   :  { %2268 = vmatmul.mubr.msk.bf16.vlgmr.msra.gmra.mrb[16].mxu0 %vm194_vm2, %v1052_v56 }
 0xddf   :  { %2272 = vmatpush3.bf16.msra.mxu0 %v2704_v47  ;;  %2275 = vmatprep.mubr.msk.bf16.mxu0 %vm2562_vm1, %v2561_v1 }
 0xde0   :  { %2273 = vmatprep.subr.bf16.mxu0 %v2561_v1 }
 0xde3   :  { %2274 = vmatpush3.bf16.msra.mxu0 %v2712_v49 }
 0xde4   :  { %2303 = vmatprep.subr.bf16.mxu0 %v2561_v1 }
 0xde9   :  { %v1164_v57 = vpop.permute.xlu1 %1163 }
 0xdea   :  { %2276 = vmatmul.mubr.msk.bf16.vlgmr.msra.gmra.mrb[16].mxu0 %vm194_vm2, %v1164_v57 }
 0xdeb   :  { %2304 = vmatpush3.bf16.msra.mxu0 %v2633_v4  ;;  %2307 = vmatprep.mubr.msk.bf16.mxu0 %vm2562_vm1, %v2561_v1 }
 0xdec   :  { %2305 = vmatprep.subr.bf16.mxu0 %v2561_v1 }
 0xdef   :  { %2306 = vmatpush3.bf16.msra.mxu0 %v2645_v6 }
 0xdf0   :  { %2311 = vmatprep.subr.bf16.mxu0 %v2561_v1 }
 0xea9   :  { %v1090_v58 = vpop.f32.mrb[12].mxu0 }
 0xeaa   :  { %v1096_v59 = vadd.f32 %v1090_v58, %v2678_v24  ;;  %v2261_v60 = vpop.f32.mrb[13].mxu0 }
 0xeab   :  { %v1093_v61 = vpop.f32.mrb[14].mxu0 }
 0xeac   :  { %2503 = vtanh.f32 %v1096_v59  ;;  %v2262_v62 = vpop.f32.mrb[15].mxu0  ;;  %v2008_v8 = vmul.f32 -1.442695, %v1096_v59 }
 0xeb6   :  { %v2504_v63 = vpop.eup %2503 }
 0xeb7   :  { %1106 = vrot.lane.b32.xlu0 %v2504_v63, %s2564_s3 }
 0xebd   :  { %v1202_v4 = vpop.f32.mrb[16].mxu0 }
 0xebe   :  { %v2347_v0 = vadd.f32 %v2736_v55, %v1202_v4  ;;  %v2277_v3 = vpop.f32.mrb[17].mxu0 }
 0xebf   :  { %v1205_v5 = vpop.f32.mrb[18].mxu0 }
 0xec0   :  { %2505 = vtanh.f32 %v2347_v0  ;;  %v2278_v7 = vpop.f32.mrb[19].mxu0  ;;  %v2011_v10 = vmul.f32 -1.442695, %v2347_v0 }
 0xec1   :  { %2507 = vpow2.f32 %v2008_v8 }
 0xeca   :  { %v2506_v6 = vpop.eup %2505 }
 0xecb   :  { %1218 = vrot.lane.b32.xlu1 %v2506_v6, %s2564_s3  ;;  %v2508_v24 = vpop.eup %2507 }
 0xecc   :  { %v1100_v9 = vadd.f32 1.0, %v2508_v24 }
 0xece   :  { %2509 = vrcp.f32 %v1100_v9 }
 0xecf   :  { %2511 = vpow2.f32 %v2011_v10 }
 0xed8   :  { %v2510_v12 = vpop.eup %2509 }
 0xed9   :  { %v2512_v16 = vpop.eup %2511  ;;  %v1104_v26 = vmul.f32 %v2510_v12, %v2872_v40 }
 0xeda   :  { %v1212_v19 = vadd.f32 1.0, %v2512_v16 }
 0xedc   :  { %2513 = vrcp.f32 %v1212_v19 }
 0xee6   :  { %v2514_v21 = vpop.eup %2513 }
 0xee7   :  { %v1216_v29 = vmul.f32 %v2514_v21, %v2877_v46 }
 0xf29   :  { %v1107_v13 = vpop.permute.xlu0 %1106 }
 0xf2a   :  { %v1109_v15 = vmul.f32 %v2510_v12, %v1107_v13 }
 0xf2c   :  { %1111 = vrot.lane.b32.xlu0 %v1109_v15, %s2565_s22 }
 0xf3d   :  { %v1219_v23 = vpop.permute.xlu1 %1218 }
 0xf3e   :  { %v1221_v25 = vmul.f32 %v2514_v21, %v1219_v23 }
 0xf40   :  { %1223 = vrot.lane.b32.xlu1 %v1221_v25, %s2565_s22 }
 0xf9e   :  { %v1112_v27 = vpop.permute.xlu0 %1111 }
 0xf9f   :  { %v2915_v20 = vadd.f32 %v1112_v27, %v1104_v26 }
 0xfa1   :  { %2515 = vtanh.f32 %v2915_v20 }
 0xfab   :  { %v2516_v28 = vpop.eup %2515 }
 0xfac   :  { %1117 = vrot.lane.b32.xlu0 %v2516_v28, %s2564_s3 }
 0xfb2   :  { %v1224_v30 = vpop.permute.xlu1 %1223 }
 0xfb3   :  { %v2920_v31 = vadd.f32 %v1224_v30, %v1216_v29 }
 0xfb5   :  { %2517 = vtanh.f32 %v2920_v31 }
 0xfbf   :  { %v2518_v33 = vpop.eup %2517 }
 0xfc0   :  { %1229 = vrot.lane.b32.xlu1 %v2518_v33, %s2564_s3 }
0x101e   :  { %v1118_v34 = vpop.permute.xlu0 %1117 }
0x101f   :  { %v1120_v35 = vmul.f32 %v2510_v12, %v1118_v34 }
0x1021   :  { %v1241_v36 = vpack.c.bf16 %v1120_v35, %v1120_v35 }
0x1023   :  { %1243 = vrot.lane.b32.xlu0 %v1241_v36, %s2565_s22 }
0x1032   :  { %v1230_v37 = vpop.permute.xlu1 %1229 }
0x1033   :  { %v2925_v38 = vmul.f32 %v2514_v21, %v1230_v37 }
0x1035   :  { %v1353_v14 = vpack.c.bf16 %v2925_v38, %v2925_v38 }
0x1037   :  { %1355 = vrot.lane.b32.xlu1 %v1353_v14, %s2565_s22 }
0x1095   :  { %v1244_v39 = vpop.permute.xlu0 %1243 }
0x1096   :  { %2284 = vmatmul.mubr.msk.bf16.vlgmr.msra.gmra.mrb[32].mxu1 %vm194_vm2, %v1244_v39 }
0x1097   :  { %2288 = vmatpush3.bf16.msra.mxu1 %v2688_v41  ;;  %2291 = vmatprep.mubr.msk.bf16.mxu1 %vm2562_vm1, %v2561_v1 }
0x1098   :  { %2289 = vmatprep.subr.bf16.mxu1 %v2561_v1 }
0x109b   :  { %2290 = vmatpush3.bf16.msra.mxu1 %v2694_v42 }
0x109c   :  { %2295 = vmatprep.subr.bf16.mxu1 %v2561_v1 }
0x109e   :  { %2292 = vmatmul.mubr.msk.bf16.vlgmr.msra.gmra.mrb[36].mxu1 %vm194_vm2, %v1244_v39 }
0x109f   :  { %2296 = vmatpush3.bf16.msra.mxu1 %v2704_v47  ;;  %2299 = vmatprep.mubr.msk.bf16.mxu1 %vm2562_vm1, %v2561_v1 }
0x10a0   :  { %2297 = vmatprep.subr.bf16.mxu1 %v2561_v1 }
0x10a3   :  { %2298 = vmatpush3.bf16.msra.mxu1 %v2712_v49 }
0x10a4   :  { %2327 = vmatprep.subr.bf16.mxu1 %v2561_v1 }
0x10a9   :  { %v1356_v40 = vpop.permute.xlu1 %1355 }
0x10aa   :  { %2300 = vmatmul.mubr.msk.bf16.vlgmr.msra.gmra.mrb[36].mxu1 %vm194_vm2, %v1356_v40 }
0x10ab   :  { %2328 = vmatpush3.bf16.msra.mxu1 %v2688_v41  ;;  %2331 = vmatprep.mubr.msk.bf16.mxu1 %vm2562_vm1, %v2561_v1 }
0x10ac   :  { %2329 = vmatprep.subr.bf16.mxu1 %v2561_v1 }
0x10af   :  { %2330 = vmatpush3.bf16.msra.mxu1 %v2694_v42 }
0x10b0   :  { %2335 = vmatprep.subr.bf16.mxu1 %v2561_v1 }
0x1169   :  { %v1282_v43 = vpop.f32.mrb[32].mxu1 }
0x116a   :  { %v1288_v44 = vadd.f32 %v1282_v43, %v2672_v18  ;;  %v2285_v45 = vpop.f32.mrb[33].mxu1 }
0x116b   :  { %v1285_v46 = vpop.f32.mrb[34].mxu1 }
0x116c   :  { %2519 = vtanh.f32 %v1288_v44  ;;  %v2286_v48 = vpop.f32.mrb[35].mxu1  ;;  %v2013_v58 = vmul.f32 -1.442695, %v1288_v44 }
0x1176   :  { %v2520_v50 = vpop.eup %2519 }
0x1177   :  { %1298 = vrot.lane.b32.xlu0 %v2520_v50, %s2564_s3 }
0x117d   :  { %v1394_v51 = vpop.f32.mrb[36].mxu1 }
0x117e   :  { %v2348_v52 = vadd.f32 %v2736_v55, %v1394_v51  ;;  %v2301_v11 = vpop.f32.mrb[37].mxu1 }
0x117f   :  { %v1397_v54 = vpop.f32.mrb[38].mxu1 }
0x1180   :  { %2521 = vtanh.f32 %v2348_v52  ;;  %v2302_v56 = vpop.f32.mrb[39].mxu1  ;;  %v2016_v60 = vmul.f32 -1.442695, %v2348_v52 }
0x1181   :  { %2523 = vpow2.f32 %v2013_v58 }
0x118a   :  { %v2522_v57 = vpop.eup %2521 }
0x118b   :  { %1410 = vrot.lane.b32.xlu1 %v2522_v57, %s2564_s3  ;;  %v2524_v18 = vpop.eup %2523 }
0x118c   :  { %v1292_v59 = vadd.f32 1.0, %v2524_v18 }
0x118e   :  { %2525 = vrcp.f32 %v1292_v59 }
0x118f   :  { %2527 = vpow2.f32 %v2016_v60 }
0x1198   :  { %v2526_v61 = vpop.eup %2525 }
0x1199   :  { %v2528_v4 = vpop.eup %2527  ;;  %v1296_v6 = vmul.f32 %v2526_v61, %v2915_v20 }
0x119a   :  { %v1404_v0 = vadd.f32 1.0, %v2528_v4 }
0x119c   :  { %2529 = vrcp.f32 %v1404_v0 }
0x11a6   :  { %v2530_v3 = vpop.eup %2529 }
0x11a7   :  { %v1408_v10 = vmul.f32 %v2530_v3, %v2920_v31 }
0x11e9   :  { %v1299_v62 = vpop.permute.xlu0 %1298 }
0x11ea   :  { %v1301_v63 = vmul.f32 %v2526_v61, %v1299_v62 }
0x11ec   :  { %1303 = vrot.lane.b32.xlu0 %v1301_v63, %s2565_s22 }
0x11fd   :  { %v1411_v5 = vpop.permute.xlu1 %1410 }
0x11fe   :  { %v1413_v7 = vmul.f32 %v2530_v3, %v1411_v5  ;;  %v2559_v5 = vld [vmem:[%s3099_s5] sm:$0xff]  }
0x1200   :  { %1415 = vrot.lane.b32.xlu1 %v1413_v7, %s2565_s22  ;;  %v2560_v7 = vld [vmem:[%s3099_s5 + $0x8] sm:$0xff]  }
0x125e   :  { %v1304_v8 = vpop.permute.xlu0 %1303 }
0x125f   :  { %v2958_v24 = vadd.f32 %v1304_v8, %v1296_v6 }
0x1261   :  { %2531 = vtanh.f32 %v2958_v24 }
0x126b   :  { %v2532_v9 = vpop.eup %2531 }
0x126c   :  { %1309 = vrot.lane.b32.xlu0 %v2532_v9, %s2564_s3 }
0x1272   :  { %v1416_v12 = vpop.permute.xlu1 %1415 }
0x1273   :  { %v2963_v13 = vadd.f32 %v1416_v12, %v1408_v10 }
0x1275   :  { %2533 = vtanh.f32 %v2963_v13 }
0x127f   :  { %v2534_v15 = vpop.eup %2533 }
0x1280   :  { %1421 = vrot.lane.b32.xlu1 %v2534_v15, %s2564_s3 }
0x12de   :  { %v1310_v16 = vpop.permute.xlu0 %1309 }
0x12df   :  { %v1312_v19 = vmul.f32 %v2526_v61, %v1310_v16 }
0x12e1   :  { %v1433_v21 = vpack.c.bf16 %v1312_v19, %v1312_v19 }
0x12e3   :  { %1435 = vrot.lane.b32.xlu0 %v1433_v21, %s2565_s22 }
0x12f2   :  { %v1422_v23 = vpop.permute.xlu1 %1421 }
0x12f3   :  { %v2968_v25 = vmul.f32 %v2530_v3, %v1422_v23 }
0x12f5   :  { %v1545_v26 = vpack.c.bf16 %v2968_v25, %v2968_v25 }
0x12f7   :  { %1547 = vrot.lane.b32.xlu1 %v1545_v26, %s2565_s22 }
0x1355   :  { %v1436_v27 = vpop.permute.xlu0 %1435 }
0x1356   :  { %2308 = vmatmul.mubr.msk.bf16.vlgmr.msra.gmra.mrb[20].mxu0 %vm194_vm2, %v1436_v27 }
0x1357   :  { %2312 = vmatpush3.bf16.msra.mxu0 %v2688_v41  ;;  %2315 = vmatprep.mubr.msk.bf16.mxu0 %vm2562_vm1, %v2561_v1 }
0x1358   :  { %2313 = vmatprep.subr.bf16.mxu0 %v2561_v1 }
0x135b   :  { %2314 = vmatpush3.bf16.msra.mxu0 %v2694_v42 }
0x135c   :  { %2319 = vmatprep.subr.bf16.mxu0 %v2561_v1 }
0x135e   :  { %2316 = vmatmul.mubr.msk.bf16.vlgmr.msra.gmra.mrb[24].mxu0 %vm194_vm2, %v1436_v27 }
0x135f   :  { %2320 = vmatpush3.bf16.msra.mxu0 %v2704_v47  ;;  %2323 = vmatprep.mubr.msk.bf16.mxu0 %vm2562_vm1, %v2561_v1 }
0x1360   :  { %2321 = vmatprep.subr.bf16.mxu0 %v2561_v1 }
0x1363   :  { %2322 = vmatpush3.bf16.msra.mxu0 %v2712_v49 }
0x1369   :  { %v1548_v41 = vpop.permute.xlu1 %1547 }
0x136a   :  { %2324 = vmatmul.mubr.msk.bf16.vlgmr.msra.gmra.mrb[24].mxu0 %vm194_vm2, %v1548_v41 }
0x1429   :  { %v1474_v20 = vpop.f32.mrb[20].mxu0 }
0x142a   :  { %v1480_v28 = vadd.f32 %v1474_v20, %v2676_v22  ;;  %v2309_v42 = vpop.f32.mrb[21].mxu0 }
0x142b   :  { %v1477_v29 = vpop.f32.mrb[22].mxu0 }
0x142c   :  { %2535 = vtanh.f32 %v1480_v28  ;;  %v2310_v30 = vpop.f32.mrb[23].mxu0  ;;  %v2018_v37 = vmul.f32 -1.442695, %v1480_v28 }
0x142d   :  { %v2417_v30 = vld [vmem:[%s3101_s7 + $0x48] sm:$0xff]  }
0x1436   :  { %v2536_v31 = vpop.eup %2535 }
0x1437   :  { %1490 = vrot.lane.b32.xlu0 %v2536_v31, %s2564_s3 }
0x143d   :  { %v1586_v47 = vpop.f32.mrb[24].mxu0 }
0x143e   :  { %v2349_v33 = vadd.f32 %v2736_v55, %v1586_v47  ;;  %v2325_v34 = vpop.f32.mrb[25].mxu0 }
0x143f   :  { %v1589_v35 = vpop.f32.mrb[26].mxu0  ;;  %v2419_v34 = vld [vmem:[%s3101_s7 + $0x50] sm:$0xff]  }
0x1440   :  { %2537 = vtanh.f32 %v2349_v33  ;;  %v2326_v49 = vpop.f32.mrb[27].mxu0  ;;  %v2021_v39 = vmul.f32 -1.442695, %v2349_v33  ;;  %v2418_v33 = vld [vmem:[%s3101_s7 + $0x8] sm:$0xff]  }
0x1441   :  { %2539 = vpow2.f32 %v2018_v37  ;;  %v2420_v37 = vld [vmem:[%s3101_s7 + $0x10] sm:$0xff]  }
0x144a   :  { %v2538_v36 = vpop.eup %2537 }
0x144b   :  { %1602 = vrot.lane.b32.xlu1 %v2538_v36, %s2564_s3  ;;  %v2540_v22 = vpop.eup %2539 }
0x144c   :  { %v1484_v14 = vadd.f32 1.0, %v2540_v22 }
0x144e   :  { %2541 = vrcp.f32 %v1484_v14  ;;  %v2421_v14 = vld [vmem:[%s3101_s7 + $0x58] sm:$0xff]  }
0x144f   :  { %2543 = vpow2.f32 %v2021_v39  ;;  %v2422_v39 = vld [vmem:[%s3101_s7 + $0x18] sm:$0xff]  }
0x1458   :  { %v2542_v40 = vpop.eup %2541 }
0x1459   :  { %v2544_v45 = vpop.eup %2543  ;;  %v1488_v52 = vmul.f32 %v2542_v40, %v2958_v24 }
0x145a   :  { %v1596_v46 = vadd.f32 1.0, %v2544_v45  ;;  %v2426_v45 = vld [vmem:[%s3101_s7 + $0x28] sm:$0xff]  }
0x145c   :  { %2545 = vrcp.f32 %v1596_v46  ;;  %v2427_v46 = vld [vmem:[%s3101_s7 + $0x70] sm:$0xff]  }
0x1466   :  { %v2546_v48 = vpop.eup %2545 }
0x1467   :  { %v1600_v57 = vmul.f32 %v2546_v48, %v2963_v13 }
0x14a9   :  { %v1491_v43 = vpop.permute.xlu0 %1490 }
0x14aa   :  { %v1493_v44 = vmul.f32 %v2542_v40, %v1491_v43  ;;  %v2424_v43 = vld [vmem:[%s3101_s7 + $0x20] sm:$0xff]  }
0x14ac   :  { %1495 = vrot.lane.b32.xlu0 %v1493_v44, %s2565_s22  ;;  %v2425_v44 = vld [vmem:[%s3101_s7 + $0x68] sm:$0xff]  }
0x14bd   :  { %v1603_v50 = vpop.permute.xlu1 %1602 }
0x14be   :  { %v1605_v51 = vmul.f32 %v2546_v48, %v1603_v50  ;;  %v2429_v50 = vld [vmem:[%s3101_s7 + $0x78] sm:$0xff]  }
0x14c0   :  { %1607 = vrot.lane.b32.xlu1 %v1605_v51, %s2565_s22  ;;  %v2430_v51 = vld [vmem:[%s3101_s7 + $0x38] sm:$0xff]  }
0x151e   :  { %v1496_v11 = vpop.permute.xlu0 %1495 }
0x151f   :  { %v1498_v54 = vadd.f32 %v1496_v11, %v1488_v52 }
0x1521   :  { %2547 = vtanh.f32 %v1498_v54 }
0x152b   :  { %v2548_v56 = vpop.eup %2547 }
0x152c   :  { %1501 = vrot.lane.b32.xlu0 %v2548_v56, %s2564_s3 }
0x1532   :  { %v1608_v58 = vpop.permute.xlu1 %1607 }
0x1533   :  { %v1610_v18 = vadd.f32 %v1608_v58, %v1600_v57 }
0x1535   :  { %2549 = vtanh.f32 %v1610_v18 }
0x153f   :  { %v2550_v59 = vpop.eup %2549 }
0x1540   :  { %1613 = vrot.lane.b32.xlu1 %v2550_v59, %s2564_s3 }
0x159e   :  { %v1502_v60 = vpop.permute.xlu0 %1501 }
0x159f   :  { %v1504_v61 = vmul.f32 %v2542_v40, %v1502_v60  ;;  %v2423_v40 = vld [vmem:[%s3101_s7 + $0x60] sm:$0xff]  }
0x15a1   :  { %v1623_v62 = vpack.c.bf16 %v1504_v61, %v1504_v61 }
0x15a3   :  { %1625 = vrot.lane.b32.xlu0 %v1623_v62, %s2565_s22 }
0x15b2   :  { %v1614_v63 = vpop.permute.xlu1 %1613 }
0x15b3   :  { %v1616_v4 = vmul.f32 %v2546_v48, %v1614_v63  ;;  %v2428_v48 = vld [vmem:[%s3101_s7 + $0x30] sm:$0xff]  }
0x15b5   :  { %v1670_v0 = vpack.c.bf16 %v1616_v4, %v1616_v4 }
0x15b7   :  { %1672 = vrot.lane.b32.xlu1 %v1670_v0, %s2565_s22 }
0x1615   :  { %v1626_v3 = vpop.permute.xlu0 %1625 }
0x1616   :  { %2332 = vmatmul.mubr.msk.bf16.vlgmr.msra.gmra.mrb[40].mxu1 %vm194_vm2, %v1626_v3 }
0x1617   :  { %2336 = vmatpush3.bf16.msra.mxu1 %v2559_v5  ;;  %2339 = vmatprep.mubr.msk.bf16.mxu1 %vm2562_vm1, %v2561_v1 }
0x1618   :  { %2337 = vmatprep.subr.bf16.mxu1 %v2561_v1 }
0x161b   :  { %2338 = vmatpush3.bf16.msra.mxu1 %v2560_v7 }
0x1629   :  { %v1673_v6 = vpop.permute.xlu1 %1672 }
0x162a   :  { %2340 = vmatmul.mubr.msk.bf16.vlgmr.msra.gmra.mrb[40].mxu1 %vm194_vm2, %v1673_v6 }
0x16fd   :  { %v1711_v8 = vpop.f32.mrb[40].mxu1 }
0x16fe   :  { %v2350_v24 = vadd.f32 %v2736_v55, %v1711_v8  ;;  %v2341_v9 = vpop.f32.mrb[41].mxu1 }
0x16ff   :  { %v1714_v10 = vpop.f32.mrb[42].mxu1 }
0x1700   :  { %2551 = vtanh.f32 %v2350_v24  ;;  %v2342_v12 = vpop.f32.mrb[43].mxu1  ;;  %v2024_v15 = vmul.f32 -1.442695, %v2350_v24 }
0x1702   :  { %2553 = vpow2.f32 %v2024_v15 }
0x170a   :  { %v2552_v13 = vpop.eup %2551 }
0x170b   :  { %1727 = vrot.lane.b32.xlu0 %v2552_v13, %s2564_s3 }
0x170c   :  { %v2554_v1 = vpop.eup %2553 }
0x170d   :  { %v1721_v16 = vadd.f32 1.0, %v2554_v1  ;;  %v2025_v1 = vld [vmem:[%s3102_s8] ss:$0 sm:$0xff] }
0x170f   :  { %2555 = vrcp.f32 %v1721_v16 }
0x1719   :  { %v2556_v19 = vpop.eup %2555 }
0x171a   :  { %v1725_v55 = vmul.f32 %v2556_v19, %v1610_v18 }
0x177d   :  { %v1728_v21 = vpop.permute.xlu0 %1727 }
0x177e   :  { %v1730_v23 = vmul.f32 %v2556_v19, %v1728_v21 }
0x1780   :  { %1732 = vrot.lane.b32.xlu1 %v1730_v23, %s2565_s22 }
0x1784   :  { %1426 = vrot.lane.b32.xlu1 %v2968_v25, %s2565_s22 }
0x1788   :  { %1618 = vrot.lane.b32.xlu1 %v1616_v4, %s2565_s22 }
0x17f2   :  { %v1733_v26 = vpop.permute.xlu1 %1732 }
0x17f3   :  { %v1735_v27 = vadd.f32 %v1733_v26, %v1725_v55 }
0x17f5   :  { %2557 = vtanh.f32 %v1735_v27 }
0x17f6   :  { %v1427_v41 = vpop.permute.xlu1 %1426 }
0x17f7   :  { %1430 = vst.msk [vmem:[#allocation3 + $0x28] sm:$0xff] %vm194_vm2, %v1427_v41 }
0x17fa   :  { %v1619_v20 = vpop.permute.xlu1 %1618 }
0x17fb   :  { %1622 = vst.msk [vmem:[#allocation3 + $0x30] sm:$0xff] %vm194_vm2, %v1619_v20 }
0x17ff   :  { %v2558_v28 = vpop.eup %2557 }
0x1800   :  { %1738 = vrot.lane.b32.xlu0 %v2558_v28, %s2564_s3 }
0x1802   :  { %v1754_v35 = vld [vmem:[#allocation3 + $0x30] sm:$0xff] }
0x1804   :  { %658 = vrot.lane.b32.xlu0 %v2796_v17, %s2565_s22 }
0x1808   :  { %850 = vrot.lane.b32.xlu0 %v2839_v2, %s2565_s22  ;;  %v2415_v2 = vld [vmem:[%s3101_s7 + $0x40] sm:$0xff]  }
0x1809   :  { %2119 = vmatprep.subr.bf16.mxu0 %v2415_v2 }
0x180c   :  { %1042 = vrot.lane.b32.xlu0 %v2882_v53, %s2565_s22  ;;  %v1753_v53 = vld [vmem:[#allocation3 + $0x28] sm:$0xff] }
0x1810   :  { %467 = vrot.lane.b32.xlu0 %v2753_v32, %s2565_s22  ;;  %v2416_v32 = vld [vmem:[%s3101_s7] sm:$0xff]  }
0x1811   :  { %2120 = vmatpush3.bf16.msra.mxu0 %v2416_v32 }
0x1812   :  { %2121 = vmatprep.subr.bf16.mxu0 %v2417_v30 }
0x1815   :  { %2122 = vmatpush3.bf16.msra.mxu0 %v2418_v33 }
0x1816   :  { %2123 = vmatprep.subr.bf16.mxu0 %v2419_v34 }
0x1819   :  { %2124 = vmatpush3.bf16.msra.mxu0 %v2420_v37 }
0x181a   :  { %2125 = vmatprep.subr.bf16.mxu0 %v2421_v14 }
0x181d   :  { %2126 = vmatpush3.bf16.msra.mxu0 %v2422_v39 }
0x181e   :  { %2127 = vmatprep.subr.bf16.mxu0 %v2423_v40 }
0x1821   :  { %2128 = vmatpush3.bf16.msra.mxu0 %v2424_v43 }
0x1822   :  { %2129 = vmatprep.subr.bf16.mxu0 %v2425_v44 }
0x1825   :  { %2130 = vmatpush3.bf16.msra.mxu0 %v2426_v45 }
0x1826   :  { %2131 = vmatprep.subr.bf16.mxu0 %v2427_v46 }
0x1829   :  { %2132 = vmatpush3.bf16.msra.mxu0 %v2428_v48 }
0x182a   :  { %2133 = vmatprep.subr.bf16.mxu0 %v2429_v50 }
0x182d   :  { %2134 = vmatpush3.bf16.msra.mxu0 %v2430_v51 }
0x1872   :  { %v1739_v25 = vpop.permute.xlu0 %1738 }
0x1873   :  { %v1741_v42 = vmul.f32 %v2556_v19, %v1739_v25 }
0x1875   :  { %1743 = vrot.lane.b32.xlu1 %v1741_v42, %s2565_s22 }
0x1876   :  { %v659_v29 = vpop.permute.xlu0 %658 }
0x1877   :  { %662 = vst.msk [vmem:[#allocation3 + $0x8] sm:$0xff] %vm194_vm2, %v659_v29 }
0x1879   :  { %1234 = vrot.lane.b32.xlu1 %v2925_v38, %s2565_s22 }
0x187a   :  { %v851_v17 = vpop.permute.xlu0 %850 }
0x187b   :  { %854 = vst.msk [vmem:[#allocation3 + $0x10] sm:$0xff] %vm194_vm2, %v851_v17 }
0x187e   :  { %v1043_v31 = vpop.permute.xlu0 %1042  ;;  %v1749_v47 = vld [vmem:[#allocation3 + $0x8] sm:$0xff] }
0x187f   :  { %1046 = vst.msk [vmem:[#allocation3 + $0x18] sm:$0xff] %vm194_vm2, %v1043_v31  ;;  %v2389_v38 = vpack.i.bf16 %v1749_v47, %v1753_v53 }
0x1881   :  { %2390 = vrot.lane.b32.xlu1 %v2389_v38, %s2565_s22 }
0x1882   :  { %v468_v49 = vpop.permute.xlu0 %467  ;;  %v1750_v36 = vld [vmem:[#allocation3 + $0x10] sm:$0xff] }
0x1883   :  { %470 = vst.msk [vmem:[#allocation3] sm:$0xff] %vm194_vm2, %v468_v49  ;;  %v2394_v22 = vpack.i.bf16 %v1750_v36, %v1754_v35 }
0x1885   :  { %2395 = vrot.lane.b32.xlu0 %v2394_v22, %s2564_s3 }
0x1886   :  { %v1751_v54 = vld [vmem:[#allocation3 + $0x18] sm:$0xff] }
0x188a   :  { %v1748_v4 = vld [vmem:[#allocation3] sm:$0xff] }
0x18e7   :  { %v1744_v52 = vpop.permute.xlu1 %1743 }
0x18e8   :  { %1747 = vst.msk [vmem:[#allocation3 + $0x38] sm:$0xff] %vm194_vm2, %v1744_v52 }
0x18eb   :  { %v1235_v11 = vpop.permute.xlu1 %1234 }
0x18ec   :  { %1238 = vst.msk [vmem:[#allocation3 + $0x20] sm:$0xff] %vm194_vm2, %v1235_v11 }
0x18ef   :  { %v1755_v56 = vld [vmem:[#allocation3 + $0x38] sm:$0xff] }
0x18f0   :  { %v2399_v57 = vpack.i.bf16 %v1751_v54, %v1755_v56 }
0x18f2   :  { %2400 = vrot.lane.b32.xlu1 %v2399_v57, %s2566_s16 }
0x18f3   :  { %v2391_v58 = vpop.permute.xlu1 %2390  ;;  %v1752_v63 = vld [vmem:[#allocation3 + $0x20] sm:$0xff] }
0x18f4   :  { %v2393_v59 = vunpack.i.h.bf16 %v2391_v58  ;;  %v2392_v60 = vunpack.i.l.bf16 %v2391_v58 }
0x18f6   :  { %v1780_v3 = vsel %vm194_vm2, %v1748_v4, %v2393_v59  ;;  %v1785_v5 = vsel %vm194_vm2, %v1752_v63, %v2392_v60 }
0x18f7   :  { %v2396_v18 = vpop.permute.xlu0 %2395 }
0x18f8   :  { %v2398_v61 = vunpack.i.h.bf16 %v2396_v18  ;;  %v2397_v62 = vunpack.i.l.bf16 %v2396_v18 }
0x18fa   :  { %v1782_v8 = vsel %vm1781_vm3, %v1780_v3, %v2398_v61  ;;  %v1786_v24 = vsel %vm1781_vm3, %v1785_v5, %v2397_v62 }
0x1964   :  { %v2401_v0 = vpop.permute.xlu1 %2400 }
0x1965   :  { %v2403_v7 = vunpack.i.h.bf16 %v2401_v0  ;;  %v2402_v6 = vunpack.i.l.bf16 %v2401_v0 }
0x1967   :  { %v1784_v9 = vsel %vm1783_vm4, %v1782_v8, %v2403_v7  ;;  %v1787_v10 = vsel %vm1783_vm4, %v1786_v24, %v2402_v6 }
0x1968   :  { %v1788_v12 = vpack.c.bf16 %v1784_v9, %v1784_v9  ;;  %v1789_v13 = vpack.c.bf16 %v1787_v10, %v1787_v10 }
0x196a   :  { %1957 = vmatprep.mubr.bf16.mxu0 %v1789_v13 }
0x196b   :  { %1958 = vmatmul.mubr.bf16.vlgmr.msra.gmra.mrb[28].mxu0 %v1788_v12 }
0x1a3e   :  { %v2135_v15 = vpop.f32.mrb[28].mxu0 }
0x1a3f   :  { %v2136_v16 = vpop.f32.mrb[29].mxu0 }
0x1a40   :  { %v2137_v19 = vadd.f32 %v2136_v16, %v2135_v15  ;;  %v2138_v21 = vpop.f32.mrb[30].mxu0 }
0x1a41   :  { %v2139_v23 = vpop.f32.mrb[31].mxu0 }
0x1a42   :  { %v1960_v55 = vadd.f32 %v2137_v19, %v2025_v1 }
0x1a44   :  { %1965 = vst [vmem:[%s3103_s9] sm:$0xff] %v1960_v55 }

</bundles_post_ra>
